<compile_context>
chip_gen: v5e
topology: v5e:2x2
jax: 0.10.0
libtpu: 0.0.40
codegen_flags: <defaults>
</compile_context>

<pallas_src>
import functools

import jax
import jax.numpy as jnp
from jax import lax
from jax.experimental import pallas as pl
from jax.experimental.pallas import tpu as pltpu

_MASK_BIAS = -1e9          # matches torch masked_fill_(mask == 0, -1e9)
_PAD_BIAS = -1e30          # padded key columns: strictly below any real logit


def _round_up(x, m):
    return ((x + m - 1) // m) * m


def _pick_divisor(n, candidates):
    for c in candidates:
        if n % c == 0:
            return c
    return 128


def _sdpa_kernel(*refs, scale, has_bias, n_inner, tk, mxu_dtype):
    if has_bias:
        q_ref, k_ref, v_ref, b_ref, o_ref, m_scr, l_scr, acc_scr = refs
    else:
        q_ref, k_ref, v_ref, o_ref, m_scr, l_scr, acc_scr = refs
        b_ref = None

    ko = pl.program_id(2)

    @pl.when(ko == 0)
    def _init():
        m_scr[...] = jnp.full_like(m_scr, -jnp.inf)
        l_scr[...] = jnp.zeros_like(l_scr)
        acc_scr[...] = jnp.zeros_like(acc_scr)

    q = q_ref[0]                                      # (tq, D), native dtype
    if scale is not None:
        # Fold scale into Q once per q-tile (O(tq*D), done before the MXU cast
        # so f32 inputs are scaled in f32).
        q = q * jnp.asarray(scale, dtype=q.dtype)
    q = q.astype(mxu_dtype)                           # bf16-native MXU operand

    def kv_step(j):
        if isinstance(j, int):
            start = j * tk
        else:
            start = pl.multiple_of(j * tk, tk)

        k = k_ref[0, pl.ds(start, tk), :].astype(mxu_dtype)      # (tk, D)
        # s = Q @ K^T: contract last dims of both operands (no k.T relayout).
        s = lax.dot_general(
            q, k, dimension_numbers=(((1,), (1,)), ((), ())),
            preferred_element_type=jnp.float32)                  # (tq, tk) f32
        if has_bias:
            s = s + b_ref[0, :, pl.ds(start, tk)]                # (1, tk)

        # Online (flash) softmax update; state lives in f32 VMEM scratch.
        m_prev = m_scr[...]
        m_new = jnp.maximum(m_prev, jnp.max(s, axis=-1, keepdims=True))
        alpha = jnp.exp(m_prev - m_new)
        p = jnp.exp(s - m_new)

        l_scr[...] = alpha * l_scr[...] + jnp.sum(p, axis=-1, keepdims=True)
        v = v_ref[0, pl.ds(start, tk), :].astype(mxu_dtype)      # (tk, D)
        acc_scr[...] = alpha * acc_scr[...] + jnp.dot(
            p.astype(mxu_dtype), v, preferred_element_type=jnp.float32)
        m_scr[...] = m_new

    if n_inner == 1:
        kv_step(0)
    else:
        @pl.loop(0, n_inner, unroll=(n_inner <= 4))
        def _kv_loop(j):
            kv_step(j)

    @pl.when(ko == pl.num_programs(2) - 1)
    def _finalize():
        l = l_scr[...]
        inv = pl.reciprocal(l, approx=True)           # EUP slot, once per q-tile
        inv = inv * (2.0 - l * inv)                   # one NR step -> ~f32 accuracy
        o_ref[0] = (acc_scr[...] * inv).astype(o_ref.dtype)


def scaled_dot_product_attention(Q, K, V, scale=None, mask=None,
                                 allow_bf16_matmul=True):
    """Pallas flash-SDPA matching Scaled_Dot_Product_Attention.forward.

    Q, K, V: [B, S, D].  mask (optional): [B, S] key mask (0 = masked),
    broadcast over query rows (the torch mask.unsqueeze(1)).
    `scale` must be a Python number; falsy scale (None / 0) means no scaling,
    mirroring torch's `if scale:`.
    """
    B, S, D = Q.shape
    if not scale:            # torch semantics: `if scale:` -> 0 / None skip
        scale = None

    itemsize = jnp.dtype(Q.dtype).itemsize

    # bf16-native MXU on v5e/v6e/v7x: cast only the matmul operands; softmax
    # state / accumulation stay f32.
    if allow_bf16_matmul and Q.dtype == jnp.dtype(jnp.float32):
        mxu_dtype = jnp.bfloat16
    else:
        mxu_dtype = Q.dtype

    # Pad the sequence only to a 128 multiple (lane-dense logits tiles); D is
    # kept native via the "block dim == full array dim" exception, avoiding a
    # full extra HBM pass over Q/K/V.
    Sp = _round_up(S, 128)
    if Sp > S:
        pad = ((0, 0), (0, Sp - S), (0, 0))
        Qp, Kp, Vp = jnp.pad(Q, pad), jnp.pad(K, pad), jnp.pad(V, pad)
    else:
        Qp, Kp, Vp = Q, K, V

    # Per-generation VMEM budget (v5e/v6e: 128 MiB phys -> ~96 MiB limit,
    # v7x: 64 MiB -> ~48 MiB limit).
    try:
        vmem_cap = pltpu.get_tpu_info().vmem_capacity_bytes
    except Exception:
        vmem_cap = 64 * 1024 * 1024
    vmem_limit = min(int(vmem_cap) * 3 // 4, 100 * 1024 * 1024)
    kv_budget = int(vmem_limit * 0.7)

    tk = _pick_divisor(Sp, (512, 256, 128))        # inner kv chunk (lane dim of s)
    per_key = 2 * (2 * D * itemsize + 4)           # K + V + bias, double-buffered

    def _fits(skv, tq):
        fixed = 2 * 2 * tq * D * itemsize          # Q + out blocks, double-buffered
        fixed += tq * (D + 2) * 4                  # f32 m/l/acc scratch
        return fixed + skv * per_key <= kv_budget

    if _fits(Sp, 256):
        # Fully VMEM-resident K/V: the block index does not change across
        # q-tiles, so K/V are DMA'd from HBM once per batch element.
        skv = Sp
        tq = _pick_divisor(Sp, (256, 128))
    else:
        # Tiled fallback for very long S: bigger q tile halves the K/V
        # re-read factor; skv = largest multiple of tk (dividing Sp) that fits.
        tq = _pick_divisor(Sp, (512, 256, 128))
        n_chunks = Sp // tk
        g = 1
        for cand in range(1, n_chunks + 1):
            if n_chunks % cand == 0 and _fits(cand * tk, tq):
                g = cand
        skv = g * tk

    # v7x megacore: make sure both TensorCores get q-tiles when B is small.
    while B * (Sp // tq) < 2 and tq > 128:
        tq //= 2

    n_q = Sp // tq
    n_ko = Sp // skv
    n_inner = skv // tk

    need_bias = (mask is not None) or (Sp > S)

    q_spec = pl.BlockSpec((1, tq, D), lambda b, qi, ko: (b, qi, 0))
    kv_spec = pl.BlockSpec((1, skv, D), lambda b, qi, ko: (b, ko, 0))
    o_spec = pl.BlockSpec((1, tq, D), lambda b, qi, ko: (b, qi, 0))

    in_specs = [q_spec, kv_spec, kv_spec]
    args = [Qp, Kp, Vp]

    if need_bias:
        bias = jnp.zeros((B, Sp), dtype=jnp.float32)
        if mask is not None:
            key_bias = jnp.where(mask.reshape(B, S) == 0,
                                 jnp.float32(_MASK_BIAS), jnp.float32(0.0))
            bias = bias.at[:, :S].set(key_bias)
        if Sp > S:
            bias = bias.at[:, S:].set(jnp.float32(_PAD_BIAS))
        args.append(bias.reshape(B, 1, Sp))
        in_specs.append(pl.BlockSpec((1, 1, skv), lambda b, qi, ko: (b, 0, ko)))

    kernel = functools.partial(_sdpa_kernel, scale=scale, has_bias=need_bias,
                               n_inner=n_inner, tk=tk, mxu_dtype=mxu_dtype)

    out = pl.pallas_call(
        kernel,
        out_shape=jax.ShapeDtypeStruct((B, Sp, D), Q.dtype),
        grid_spec=pltpu.PrefetchScalarGridSpec(
            num_scalar_prefetch=0,
            grid=(B, n_q, n_ko),
            in_specs=in_specs,
            out_specs=o_spec,
            scratch_shapes=[
                pltpu.VMEM((tq, 1), jnp.float32),    # running max
                pltpu.VMEM((tq, 1), jnp.float32),    # running sum
                pltpu.VMEM((tq, D), jnp.float32),    # output accumulator
            ]),
        compiler_params=pltpu.CompilerParams(
            dimension_semantics=("parallel", "parallel", "arbitrary"),
            vmem_limit_bytes=vmem_limit),
    )(*args)

    if Sp > S:
        out = out[:, :S, :]
    return out


def _reference(Q, K, V, scale=None, mask=None):
    attn = jnp.einsum("bqd,bkd->bqk",
                      Q.astype(jnp.float32), K.astype(jnp.float32))
    if scale:
        attn = attn * scale
    if mask is not None:
        attn = jnp.where(mask[:, None, :] == 0, jnp.float32(_MASK_BIAS), attn)
    attn = jax.nn.softmax(attn, axis=-1)
    return jnp.einsum("bqk,bkd->bqd", attn, V.astype(jnp.float32)).astype(Q.dtype)


if __name__ == "__main__":
    key = jax.random.PRNGKey(0)
    kq, kk, kvk = jax.random.split(key, 3)

    # Small shapes consistent with the encoder usage.
    B, S, D = 2, 8, 32
    Q = jax.random.normal(kq, (B, S, D), dtype=jnp.float32)
    K = jax.random.normal(kk, (B, S, D), dtype=jnp.float32)
    V = jax.random.normal(kvk, (B, S, D), dtype=jnp.float32)
    scale = 1.0 / (D ** 0.5)
    mask = jnp.ones((B, S), dtype=jnp.int32).at[:, S // 2:].set(0)

    # 1) exact path (f32 MXU operands) vs reference — unmasked and masked.
    out = jax.block_until_ready(
        scaled_dot_product_attention(Q, K, V, scale=scale,
                                     allow_bf16_matmul=False))
    ref = _reference(Q, K, V, scale=scale)
    assert out.shape == (B, S, D)
    assert jnp.allclose(out, ref, atol=1e-4, rtol=1e-4), "f32 unmasked mismatch"

    out_m = jax.block_until_ready(
        scaled_dot_product_attention(Q, K, V, scale=scale, mask=mask,
                                     allow_bf16_matmul=False))
    ref_m = _reference(Q, K, V, scale=scale, mask=mask)
    assert jnp.allclose(out_m, ref_m, atol=1e-4, rtol=1e-4), "f32 masked mismatch"

    # 2) default fast path (bf16 MXU operands, f32 softmax state).
    out_bf = jax.block_until_ready(
        scaled_dot_product_attention(Q, K, V, scale=scale, mask=mask))
    assert jnp.allclose(out_bf, ref_m, atol=5e-2, rtol=5e-2), "bf16 masked mismatch"

    # 3) longer sequence: exercises the in-kernel kv loop over resident K/V.
    B2, S2, D2 = 2, 640, 64
    k2q, k2k, k2v = jax.random.split(jax.random.PRNGKey(1), 3)
    Q2 = jax.random.normal(k2q, (B2, S2, D2), dtype=jnp.float32)
    K2 = jax.random.normal(k2k, (B2, S2, D2), dtype=jnp.float32)
    V2 = jax.random.normal(k2v, (B2, S2, D2), dtype=jnp.float32)
    s2 = 1.0 / (D2 ** 0.5)
    out2 = jax.block_until_ready(
        scaled_dot_product_attention(Q2, K2, V2, scale=s2))
    ref2 = _reference(Q2, K2, V2, scale=s2)
    assert jnp.allclose(out2, ref2, atol=5e-2, rtol=5e-2), "long-seq mismatch"

    print("KERNEL_OK")
</pallas_src>

<mosaic_0001>
module attributes {stable_mosaic.version = 11 : i64} {
  func.func @_sdpa_kernel(%arg0: i32, %arg1: i32, %arg2: i32, %arg3: memref<1x128x32xf32, #tpu.memory_space<vmem>>, %arg4: memref<1x128x32xf32, #tpu.memory_space<vmem>>, %arg5: memref<1x128x32xf32, #tpu.memory_space<vmem>>, %arg6: memref<1x1x128xf32, #tpu.memory_space<vmem>>, %arg7: memref<1x128x32xf32, #tpu.memory_space<vmem>>, %arg8: memref<128x1xf32, #tpu.memory_space<vmem>>, %arg9: memref<128x1xf32, #tpu.memory_space<vmem>>, %arg10: memref<128x32xf32, #tpu.memory_space<vmem>>) attributes {dimension_semantics = [#tpu.dimension_semantics<parallel>, #tpu.dimension_semantics<parallel>, #tpu.dimension_semantics<arbitrary>], iteration_bounds = array<i64: 2, 1, 1>, scalar_prefetch = 0 : i64, scratch_operands = 3 : i64, tpu.core_type = #tpu.core_type<tc>, window_params = [{transform_indices = @transform_0, window_bounds = array<i64: 1, 128, 32>}, {transform_indices = @transform_1, window_bounds = array<i64: 1, 128, 32>}, {transform_indices = @transform_2, window_bounds = array<i64: 1, 128, 32>}, {transform_indices = @transform_3, window_bounds = array<i64: 1, 1, 128>}, {transform_indices = @transform_4, window_bounds = array<i64: 1, 128, 32>}]} {
    %c0_i32 = arith.constant 0 : i32
    %0 = arith.cmpi eq, %arg2, %c0_i32 : i32
    %1 = arith.extui %0 : i1 to i32
    %c0_i32_0 = arith.constant 0 : i32
    %2 = arith.cmpi ne, %1, %c0_i32_0 : i32
    scf.if %2 {
      %cst_30 = arith.constant 0xFF800000 : f32
      %41 = vector.broadcast %cst_30 : f32 to vector<128x1xf32>
      %c0_31 = arith.constant 0 : index
      %c0_32 = arith.constant 0 : index
      %42 = vector.load %arg8[%c0_31, %c0_32] : memref<128x1xf32, #tpu.memory_space<vmem>>, vector<128x1xf32>
      tpu.vector_store %arg8[%c0_31, %c0_32], %41 {strides = array<i32>} : memref<128x1xf32, #tpu.memory_space<vmem>>, vector<128x1xf32>,
      %cst_33 = arith.constant 0.000000e+00 : f32
      %43 = vector.broadcast %cst_33 : f32 to vector<128x1xf32>
      %c0_34 = arith.constant 0 : index
      %c0_35 = arith.constant 0 : index
      %44 = vector.load %arg9[%c0_34, %c0_35] : memref<128x1xf32, #tpu.memory_space<vmem>>, vector<128x1xf32>
      tpu.vector_store %arg9[%c0_34, %c0_35], %43 {strides = array<i32>} : memref<128x1xf32, #tpu.memory_space<vmem>>, vector<128x1xf32>,
      %cst_36 = arith.constant 0.000000e+00 : f32
      %45 = vector.broadcast %cst_36 : f32 to vector<128x32xf32>
      %c0_37 = arith.constant 0 : index
      %c0_38 = arith.constant 0 : index
      %46 = vector.load %arg10[%c0_37, %c0_38] : memref<128x32xf32, #tpu.memory_space<vmem>>, vector<128x32xf32>
      tpu.vector_store %arg10[%c0_37, %c0_38], %45 {strides = array<i32>} : memref<128x32xf32, #tpu.memory_space<vmem>>, vector<128x32xf32>,
    } else {
    }
    %c0 = arith.constant 0 : index
    %c0_1 = arith.constant 0 : index
    %c0_2 = arith.constant 0 : index
    %3 = vector.load %arg3[%c0, %c0_1, %c0_2] : memref<1x128x32xf32, #tpu.memory_space<vmem>>, vector<1x128x32xf32>
    %4 = vector.shape_cast %3 : vector<1x128x32xf32> to vector<128x32xf32>
    %cst = arith.constant 0.176776692 : f32
    %5 = vector.broadcast %cst : f32 to vector<128x32xf32>
    %6 = arith.mulf %4, %5 : vector<128x32xf32>
    %c0_3 = arith.constant 0 : index
    %c0_4 = arith.constant 0 : index
    %c0_5 = arith.constant 0 : index
    %7 = vector.load %arg4[%c0_3, %c0_4, %c0_5] : memref<1x128x32xf32, #tpu.memory_space<vmem>>, vector<1x128x32xf32>
    %8 = vector.shape_cast %7 : vector<1x128x32xf32> to vector<128x32xf32>
    %cst_6 = arith.constant dense<0.000000e+00> : vector<128x128xf32>
    %9 = tpu.matmul %6, %8, %cst_6 {dimension_numbers = #tpu.dot_dimension_numbers<[1], [1], [0], [0], [0, 0, 1, 0], [], []>} : vector<128x32xf32>, vector<128x32xf32>, vector<128x128xf32> -> vector<128x128xf32>
    %c0_7 = arith.constant 0 : index
    %c0_8 = arith.constant 0 : index
    %c0_9 = arith.constant 0 : index
    %10 = vector.load %arg6[%c0_7, %c0_8, %c0_9] : memref<1x1x128xf32, #tpu.memory_space<vmem>>, vector<1x1x128xf32>
    %11 = vector.shape_cast %10 : vector<1x1x128xf32> to vector<1x128xf32>
    %12 = vector.broadcast %11 : vector<1x128xf32> to vector<128x128xf32>
    %13 = arith.addf %9, %12 : vector<128x128xf32>
    %c0_10 = arith.constant 0 : index
    %c0_11 = arith.constant 0 : index
    %14 = vector.load %arg8[%c0_10, %c0_11] : memref<128x1xf32, #tpu.memory_space<vmem>>, vector<128x1xf32>
    %cst_12 = arith.constant dense<0xFF800000> : vector<128xf32>
    %15 = vector.multi_reduction <maximumf>, %13, %cst_12 [1] : vector<128x128xf32> to vector<128xf32>
    %16 = vector.shape_cast %15 : vector<128xf32> to vector<128x1xf32>
    %17 = arith.maximumf %14, %16 : vector<128x1xf32>
    %18 = arith.subf %14, %17 : vector<128x1xf32>
    %19 = math.exp %18 : vector<128x1xf32>
    %20 = vector.broadcast %17 : vector<128x1xf32> to vector<128x128xf32>
    %21 = arith.subf %13, %20 : vector<128x128xf32>
    %22 = math.exp %21 : vector<128x128xf32>
    %c0_13 = arith.constant 0 : index
    %c0_14 = arith.constant 0 : index
    %23 = vector.load %arg9[%c0_13, %c0_14] : memref<128x1xf32, #tpu.memory_space<vmem>>, vector<128x1xf32>
    %24 = arith.mulf %19, %23 : vector<128x1xf32>
    %cst_15 = arith.constant dense<0.000000e+00> : vector<128xf32>
    %25 = vector.multi_reduction <add>, %22, %cst_15 [1] : vector<128x128xf32> to vector<128xf32>
    %26 = vector.shape_cast %25 : vector<128xf32> to vector<128x1xf32>
    %27 = arith.addf %24, %26 : vector<128x1xf32>
    %c0_16 = arith.constant 0 : index
    %c0_17 = arith.constant 0 : index
    %28 = vector.load %arg9[%c0_16, %c0_17] : memref<128x1xf32, #tpu.memory_space<vmem>>, vector<128x1xf32>
    tpu.vector_store %arg9[%c0_16, %c0_17], %27 {strides = array<i32>} : memref<128x1xf32, #tpu.memory_space<vmem>>, vector<128x1xf32>,
    %c0_18 = arith.constant 0 : index
    %c0_19 = arith.constant 0 : index
    %c0_20 = arith.constant 0 : index
    %29 = vector.load %arg5[%c0_18, %c0_19, %c0_20] : memref<1x128x32xf32, #tpu.memory_space<vmem>>, vector<1x128x32xf32>
    %30 = vector.shape_cast %29 : vector<1x128x32xf32> to vector<128x32xf32>
    %c0_21 = arith.constant 0 : index
    %c0_22 = arith.constant 0 : index
    %31 = vector.load %arg10[%c0_21, %c0_22] : memref<128x32xf32, #tpu.memory_space<vmem>>, vector<128x32xf32>
    %32 = vector.broadcast %19 : vector<128x1xf32> to vector<128x32xf32>
    %33 = arith.mulf %32, %31 : vector<128x32xf32>
    %cst_23 = arith.constant dense<0.000000e+00> : vector<128x32xf32>
    %34 = tpu.matmul %22, %30, %cst_23 {dimension_numbers = #tpu.dot_dimension_numbers<[1], [0], [0], [1], [0, 0, 1, 1], [], []>} : vector<128x128xf32>, vector<128x32xf32>, vector<128x32xf32> -> vector<128x32xf32>
    %35 = arith.addf %33, %34 : vector<128x32xf32>
    %c0_24 = arith.constant 0 : index
    %c0_25 = arith.constant 0 : index
    %36 = vector.load %arg10[%c0_24, %c0_25] : memref<128x32xf32, #tpu.memory_space<vmem>>, vector<128x32xf32>
    tpu.vector_store %arg10[%c0_24, %c0_25], %35 {strides = array<i32>} : memref<128x32xf32, #tpu.memory_space<vmem>>, vector<128x32xf32>,
    %c0_26 = arith.constant 0 : index
    %c0_27 = arith.constant 0 : index
    %37 = vector.load %arg8[%c0_26, %c0_27] : memref<128x1xf32, #tpu.memory_space<vmem>>, vector<128x1xf32>
    tpu.vector_store %arg8[%c0_26, %c0_27], %17 {strides = array<i32>} : memref<128x1xf32, #tpu.memory_space<vmem>>, vector<128x1xf32>,
    %c0_i32_28 = arith.constant 0 : i32
    %38 = arith.cmpi eq, %arg2, %c0_i32_28 : i32
    %39 = arith.extui %38 : i1 to i32
    %c0_i32_29 = arith.constant 0 : i32
    %40 = arith.cmpi ne, %39, %c0_i32_29 : i32
    scf.if %40 {
      %c0_30 = arith.constant 0 : index
      %c0_31 = arith.constant 0 : index
      %41 = vector.load %arg9[%c0_30, %c0_31] : memref<128x1xf32, #tpu.memory_space<vmem>>, vector<128x1xf32>
      %42 = tpu.reciprocal %41 {approx = true} : vector<128x1xf32> -> vector<128x1xf32>
      %43 = arith.mulf %41, %42 : vector<128x1xf32>
      %cst_32 = arith.constant 2.000000e+00 : f32
      %44 = vector.broadcast %cst_32 : f32 to vector<128x1xf32>
      %45 = arith.subf %44, %43 : vector<128x1xf32>
      %46 = arith.mulf %42, %45 : vector<128x1xf32>
      %c0_33 = arith.constant 0 : index
      %c0_34 = arith.constant 0 : index
      %47 = vector.load %arg10[%c0_33, %c0_34] : memref<128x32xf32, #tpu.memory_space<vmem>>, vector<128x32xf32>
      %48 = vector.broadcast %46 : vector<128x1xf32> to vector<128x32xf32>
      %49 = arith.mulf %47, %48 : vector<128x32xf32>
      %c0_35 = arith.constant 0 : index
      %c0_36 = arith.constant 0 : index
      %c0_37 = arith.constant 0 : index
      %50 = vector.load %arg7[%c0_35, %c0_36, %c0_37] : memref<1x128x32xf32, #tpu.memory_space<vmem>>, vector<1x128x32xf32>
      %51 = vector.shape_cast %50 : vector<1x128x32xf32> to vector<128x32xf32>
      %52 = vector.shape_cast %49 : vector<128x32xf32> to vector<1x128x32xf32>
      tpu.vector_store %arg7[%c0_35, %c0_36, %c0_37], %52 {strides = array<i32>} : memref<1x128x32xf32, #tpu.memory_space<vmem>>, vector<1x128x32xf32>,
    } else {
    }
    return
  }
  func.func @transform_0(%arg0: i32, %arg1: i32, %arg2: i32) -> (i32, i32, i32) {
    %c0_i32 = arith.constant 0 : i32
    %c0_i32_0 = arith.constant 0 : i32
    return %arg0, %arg1, %c0_i32 : i32, i32, i32
  }
  func.func @transform_1(%arg0: i32, %arg1: i32, %arg2: i32) -> (i32, i32, i32) {
    %c0_i32 = arith.constant 0 : i32
    %c0_i32_0 = arith.constant 0 : i32
    return %arg0, %arg2, %c0_i32 : i32, i32, i32
  }
  func.func @transform_2(%arg0: i32, %arg1: i32, %arg2: i32) -> (i32, i32, i32) {
    %c0_i32 = arith.constant 0 : i32
    %c0_i32_0 = arith.constant 0 : i32
    return %arg0, %arg2, %c0_i32 : i32, i32, i32
  }
  func.func @transform_3(%arg0: i32, %arg1: i32, %arg2: i32) -> (i32, i32, i32) {
    %c0_i32 = arith.constant 0 : i32
    %c0_i32_0 = arith.constant 0 : i32
    return %arg0, %c0_i32, %arg2 : i32, i32, i32
  }
  func.func @transform_4(%arg0: i32, %arg1: i32, %arg2: i32) -> (i32, i32, i32) {
    %c0_i32 = arith.constant 0 : i32
    %c0_i32_0 = arith.constant 0 : i32
    return %arg0, %arg1, %c0_i32 : i32, i32, i32
  }
}

</mosaic_0001>

<bundles_post_ra>
// kernel: tpu_custom_call.1
= control target key start
LH: loop header
LB: loop body
LE: loop exit
PB: predicated region body
PF: predicated region fallthrough
CT: control target
= control target key end

     0   :  { %s1830_s15 = smov 0   ;;  %s1832_s16 = smov 0   ;;  %s2451_s0 = inlined_call_operand.vmem [shape: f32[2,128,32], index: 0, kind: input, shape index: {}]   ;;  %s2452_s1 = inlined_call_operand.vmem [shape: f32[2,128,32], index: 1, kind: input, shape index: {}]   ;;  %s2453_s2 = inlined_call_operand.vmem [shape: f32[2,128,32], index: 2, kind: input, shape index: {}]   ;;  %s2454_s3 = inlined_call_operand.vmem [shape: f32[2,1,128], index: 3, kind: input, shape index: {}]   ;;  %s2455_s4 = inlined_call_operand.vmem [shape: f32[2,128,32], index: 4, kind: output, shape index: {}]  }
   0x1   :  { %s1834_s17 = smov 0  }
   0x2 LB: > { %s33_s18 = sadd.s32 1, %s1796_s16  ;;  %p1540_p0 = scmp.ge.s32.totalorder %s1800_s17, 1  ;;  %s1800_s17 = sphi %s1834_s17, %s14_s17   ;;  %s1796_s16 = sphi %s1832_s16, %s2457_s16   ;;  %s1792_s15 = sphi %s1830_s15, %s2456_s15  }
   0x3   : > { %p35_p1 = scmp.ge.s32.totalorder %s33_s18, 2  ;;  %p237_p2 = scmp.lt.s32.totalorder %s1800_s17, 3 }
   0x5   : > { %s2459_s18 = smov (%p35_p1, %s33_s18), 0  ;;  %p238_p3 = pnand %p1540_p0, %p237_p2 }
   0x6   : > { %p296_p4 = scmp.lt.s32.totalorder (!%p238_p3), %s1792_s15, 1 }
   0x7   : > { %241 = sbr.rel (%p238_p3) target bundleno = 811 (0x32b), region = 36 }
   0xc   : > { %s2461_s15 = smov (!%p296_p4, %s1792_s15), 1  ;;  %vm378_vm0 = vcmask 261120   ;;  %vm345_vm1 = vcmask 7168  }
   0xd   : > { %s1851_s19 = sshll.u32 %s2461_s15, 7  ;;  %s330_s22 = scalar_lea.vmem %s2454_s3, %s2461_s15 }
   0xe   : > { %s1861_s25 = scalar_lea.vmem %s2452_s1, %s1851_s19  ;;  %s1924_s28 = scalar_lea.vmem %s2451_s0, %s1851_s19  ;;  %v1970_v48 = vld [vmem:[%s330_s22] ss:$0 sm:$0xff] }
   0xf   : > { %v442_v0 = vld [vmem:[%s1861_s25 + $0x78] sm:$0xff]  ;;  %v441_v1 = vld [vmem:[%s1861_s25 + $0x70] sm:$0xff]  ;;  %v440_v2 = vld [vmem:[%s1861_s25 + $0x68] sm:$0xff]  ;;  %s2199_s7 = scalar_lea.vmem %s2453_s2, %s1851_s19  ;;  %s2408_s10 = scalar_lea.vmem %s2455_s4, %s1851_s19 }
  0x10   : > { %1549 = vmatpush.xpose.msk.msra.mxu0 %vm378_vm0, %v442_v0  ;;  %1587 = vmatpush.xpose.msk.msra.mxu2 %vm378_vm0, %v442_v0  ;;  %v439_v3 = vld [vmem:[%s1861_s25 + $0x60] sm:$0xff]  ;;  %v438_v4 = vld [vmem:[%s1861_s25 + $0x58] sm:$0xff]  ;;  %v437_v5 = vld [vmem:[%s1861_s25 + $0x50] sm:$0xff] }
  0x11   : > { %1588 = vmatpush.xpose.msk.msra.mxu3 %vm378_vm0, %v442_v0  ;;  %v436_v6 = vld [vmem:[%s1861_s25 + $0x48] sm:$0xff]  ;;  %v435_v7 = vld [vmem:[%s1861_s25 + $0x40] sm:$0xff]  ;;  %v434_v8 = vld [vmem:[%s1861_s25 + $0x38] sm:$0xff] }
  0x12   : > { %v433_v9 = vld [vmem:[%s1861_s25 + $0x30] sm:$0xff]  ;;  %v432_v10 = vld [vmem:[%s1861_s25 + $0x28] sm:$0xff]  ;;  %v431_v11 = vld [vmem:[%s1861_s25 + $0x20] sm:$0xff] }
  0x13   : > { %v430_v12 = vld [vmem:[%s1861_s25 + $0x18] sm:$0xff]  ;;  %v429_v13 = vld [vmem:[%s1861_s25 + $0x10] sm:$0xff]  ;;  %v428_v14 = vld [vmem:[%s1861_s25 + $0x8] sm:$0xff] }
  0x14   : > { %1550 = vmatpush.xpose.msk.msra.mxu0 %vm378_vm0, %v441_v1  ;;  %1589 = vmatpush.xpose.msk.msra.mxu2 %vm378_vm0, %v441_v1  ;;  %v395_v15 = vld [vmem:[%s1924_s28] sm:$0xff]  ;;  %v400_v16 = vld [vmem:[%s1924_s28 + $0x28] sm:$0xff]  ;;  %v401_v22 = vld [vmem:[%s1924_s28 + $0x30] sm:$0xff] }
  0x15   : > { %1590 = vmatpush.xpose.msk.msra.mxu3 %vm378_vm0, %v441_v1  ;;  %v427_v17 = vld [vmem:[%s1861_s25] sm:$0xff]  ;;  %v411_v19 = vmul.f32 0.17677669, %v395_v15  ;;  %v416_v20 = vmul.f32 0.17677669, %v400_v16  ;;  %v396_v23 = vld [vmem:[%s1924_s28 + $0x8] sm:$0xff] }
  0x16   : > { %v407_v18 = vld [vmem:[%s1924_s28 + $0x60] sm:$0xff]  ;;  %v408_v24 = vld [vmem:[%s1924_s28 + $0x68] sm:$0xff]  ;;  %v417_v25 = vmul.f32 0.17677669, %v401_v22  ;;  %v412_v26 = vmul.f32 0.17677669, %v396_v23 }
  0x17   : > { %v423_v21 = vmul.f32 0.17677669, %v407_v18  ;;  %v424_v27 = vmul.f32 0.17677669, %v408_v24  ;;  %v402_v28 = vld [vmem:[%s1924_s28 + $0x38] sm:$0xff]  ;;  %v397_v29 = vld [vmem:[%s1924_s28 + $0x10] sm:$0xff] }
  0x18   : > { %1551 = vmatpush.xpose.msk.msra.mxu0 %vm378_vm0, %v440_v2  ;;  %1591 = vmatpush.xpose.msk.msra.mxu2 %vm378_vm0, %v440_v2  ;;  %v409_v30 = vld [vmem:[%s1924_s28 + $0x70] sm:$0xff]  ;;  %v418_v31 = vmul.f32 0.17677669, %v402_v28  ;;  %v413_v32 = vmul.f32 0.17677669, %v397_v29  ;;  %v403_v34 = vld [vmem:[%s1924_s28 + $0x40] sm:$0xff] }
  0x19   : > { %1592 = vmatpush.xpose.msk.msra.mxu3 %vm378_vm0, %v440_v2  ;;  %v425_v33 = vmul.f32 0.17677669, %v409_v30  ;;  %v398_v35 = vld [vmem:[%s1924_s28 + $0x18] sm:$0xff]  ;;  %v419_v37 = vmul.f32 0.17677669, %v403_v34  ;;  %v399_v40 = vld [vmem:[%s1924_s28 + $0x20] sm:$0xff] }
  0x1a   : > { %v410_v36 = vld [vmem:[%s1924_s28 + $0x78] sm:$0xff]  ;;  %v414_v38 = vmul.f32 0.17677669, %v398_v35  ;;  %v404_v41 = vld [vmem:[%s1924_s28 + $0x48] sm:$0xff]  ;;  %v415_v42 = vmul.f32 0.17677669, %v399_v40 }
  0x1b   : > { %v426_v39 = vmul.f32 0.17677669, %v410_v36  ;;  %v420_v43 = vmul.f32 0.17677669, %v404_v41  ;;  %v405_v44 = vld [vmem:[%s1924_s28 + $0x50] sm:$0xff]  ;;  %v406_v46 = vld [vmem:[%s1924_s28 + $0x58] sm:$0xff] }
  0x1c   : > { %1552 = vmatpush.xpose.msk.msra.mxu0 %vm378_vm0, %v439_v3  ;;  %1593 = vmatpush.xpose.msk.msra.mxu2 %vm378_vm0, %v439_v3  ;;  %v421_v45 = vmul.f32 0.17677669, %v405_v44  ;;  %v422_v47 = vmul.f32 0.17677669, %v406_v46  ;;  %v1803_v18 = vmov 0  }
  0x1d   : > { %1594 = vmatpush.xpose.msk.msra.mxu3 %vm378_vm0, %v439_v3  ;;  %v1802_v3 = vmov -inf   ;;  %1678 = vset.pattern.permute.xlu1 %v1803_v18 }
  0x1e   : > { %346 = vst.msk [vmem:[#allocation2] sm:$0xff] %vm345_vm1, %v1802_v3  ;;  %1679 = vset.pattern.permute.xlu2 %v1803_v18  ;;  %1680 = vset.pattern.permute.xlu0 %v1803_v18 }
  0x1f   : > { %347 = vst.msk [vmem:[#allocation2 + $0x8] sm:$0xff] %vm345_vm1, %v1802_v3 }
  0x20   : > { %1553 = vmatpush.xpose.msk.msra.mxu0 %vm378_vm0, %v438_v4  ;;  %1595 = vmatpush.xpose.msk.msra.mxu2 %vm378_vm0, %v438_v4  ;;  %348 = vst.msk [vmem:[#allocation2 + $0x10] sm:$0xff] %vm345_vm1, %v1802_v3 }
  0x21   : > { %1596 = vmatpush.xpose.msk.msra.mxu3 %vm378_vm0, %v438_v4  ;;  %349 = vst.msk [vmem:[#allocation2 + $0x18] sm:$0xff] %vm345_vm1, %v1802_v3 }
  0x22   : > { %350 = vst.msk [vmem:[#allocation2 + $0x20] sm:$0xff] %vm345_vm1, %v1802_v3 }
  0x23   : > { %351 = vst.msk [vmem:[#allocation2 + $0x28] sm:$0xff] %vm345_vm1, %v1802_v3 }
  0x24   : > { %1554 = vmatpush.xpose.msk.msra.mxu0 %vm378_vm0, %v437_v5  ;;  %1597 = vmatpush.xpose.msk.msra.mxu2 %vm378_vm0, %v437_v5  ;;  %352 = vst.msk [vmem:[#allocation2 + $0x30] sm:$0xff] %vm345_vm1, %v1802_v3 }
  0x25   : > { %1598 = vmatpush.xpose.msk.msra.mxu3 %vm378_vm0, %v437_v5  ;;  %353 = vst.msk [vmem:[#allocation2 + $0x38] sm:$0xff] %vm345_vm1, %v1802_v3 }
  0x26   : > { %354 = vst.msk [vmem:[#allocation2 + $0x40] sm:$0xff] %vm345_vm1, %v1802_v3 }
  0x27   : > { %355 = vst.msk [vmem:[#allocation2 + $0x48] sm:$0xff] %vm345_vm1, %v1802_v3 }
  0x28   : > { %1555 = vmatpush.xpose.msk.msra.mxu0 %vm378_vm0, %v436_v6  ;;  %1599 = vmatpush.xpose.msk.msra.mxu2 %vm378_vm0, %v436_v6  ;;  %356 = vst.msk [vmem:[#allocation2 + $0x50] sm:$0xff] %vm345_vm1, %v1802_v3 }
  0x29   : > { %1600 = vmatpush.xpose.msk.msra.mxu3 %vm378_vm0, %v436_v6  ;;  %357 = vst.msk [vmem:[#allocation2 + $0x58] sm:$0xff] %vm345_vm1, %v1802_v3 }
  0x2a   : > { %358 = vst.msk [vmem:[#allocation2 + $0x60] sm:$0xff] %vm345_vm1, %v1802_v3  ;;  %v2080_v23 = vld [vmem:[#allocation2 + $0x28] sm:$0xff] }
  0x2b   : > { %359 = vst.msk [vmem:[#allocation2 + $0x68] sm:$0xff] %vm345_vm1, %v1802_v3 }
  0x2c   : > { %1556 = vmatpush.xpose.msk.msra.mxu0 %vm378_vm0, %v435_v7  ;;  %1601 = vmatpush.xpose.msk.msra.mxu2 %vm378_vm0, %v435_v7  ;;  %360 = vst.msk [vmem:[#allocation2 + $0x70] sm:$0xff] %vm345_vm1, %v1802_v3 }
  0x2d   : > { %1602 = vmatpush.xpose.msk.msra.mxu3 %vm378_vm0, %v435_v7  ;;  %361 = vst.msk [vmem:[#allocation2 + $0x78] sm:$0xff] %vm345_vm1, %v1802_v3 }
  0x30   : > { %1557 = vmatpush.xpose.msk.msra.mxu0 %vm378_vm0, %v434_v8  ;;  %1603 = vmatpush.xpose.msk.msra.mxu2 %vm378_vm0, %v434_v8 }
  0x31   : > { %1604 = vmatpush.xpose.msk.msra.mxu3 %vm378_vm0, %v434_v8 }
  0x34   : > { %1558 = vmatpush.xpose.msk.msra.mxu0 %vm378_vm0, %v433_v9  ;;  %1605 = vmatpush.xpose.msk.msra.mxu2 %vm378_vm0, %v433_v9 }
  0x35   : > { %1606 = vmatpush.xpose.msk.msra.mxu3 %vm378_vm0, %v433_v9 }
  0x38   : > { %1559 = vmatpush.xpose.msk.msra.mxu0 %vm378_vm0, %v432_v10  ;;  %1607 = vmatpush.xpose.msk.msra.mxu2 %vm378_vm0, %v432_v10 }
  0x39   : > { %1608 = vmatpush.xpose.msk.msra.mxu3 %vm378_vm0, %v432_v10 }
  0x3c   : > { %1560 = vmatpush.xpose.msk.msra.mxu0 %vm378_vm0, %v431_v11  ;;  %1609 = vmatpush.xpose.msk.msra.mxu2 %vm378_vm0, %v431_v11 }
  0x3d   : > { %1610 = vmatpush.xpose.msk.msra.mxu3 %vm378_vm0, %v431_v11 }
  0x40   : > { %1561 = vmatpush.xpose.msk.msra.mxu0 %vm378_vm0, %v430_v12  ;;  %1611 = vmatpush.xpose.msk.msra.mxu2 %vm378_vm0, %v430_v12 }
  0x41   : > { %1612 = vmatpush.xpose.msk.msra.mxu3 %vm378_vm0, %v430_v12 }
  0x44   : > { %1562 = vmatpush.xpose.msk.msra.mxu0 %vm378_vm0, %v429_v13  ;;  %1613 = vmatpush.xpose.msk.msra.mxu2 %vm378_vm0, %v429_v13 }
  0x45   : > { %1614 = vmatpush.xpose.msk.msra.mxu3 %vm378_vm0, %v429_v13 }
  0x48   : > { %1563 = vmatpush.xpose.msk.msra.mxu0 %vm378_vm0, %v428_v14  ;;  %1615 = vmatpush.xpose.msk.msra.mxu2 %vm378_vm0, %v428_v14 }
  0x49   : > { %1616 = vmatpush.xpose.msk.msra.mxu3 %vm378_vm0, %v428_v14 }
  0x4c   : > { %1564 = vmatpush.xpose.msk.msra.mxu0 %vm378_vm0, %v427_v17  ;;  %1617 = vmatpush.xpose.msk.msra.mxu2 %vm378_vm0, %v427_v17 }
  0x4d   : > { %1618 = vmatpush.xpose.msk.msra.mxu3 %vm378_vm0, %v427_v17 }
  0x4f   : > { %1565 = vmatmul.msk.f32.vlgmr.msra.gmra.mxu0 %vm378_vm0, %v411_v19  ;;  %1570 = vmatmul.msk.f32.vlgmr.msra.gmra.mxu2 %vm378_vm0, %v416_v20  ;;  %v1804_v19 = vmov 0.0   ;;  %v2067_v20 = vld [vmem:[#allocation2] sm:$0xff] }
  0x50   : > { %1577 = vmatmul.msk.f32.vlgmr.msra.gmra.mxu3 %vm378_vm0, %v423_v21  ;;  %380 = vst.msk [vmem:[#allocation4 + $0x8] sm:$0xff] %vm378_vm0, %v1804_v19 }
  0x51   : > { %362 = vst.msk [vmem:[#allocation3] sm:$0xff] %vm345_vm1, %v1804_v19 }
  0x52   : > { %363 = vst.msk [vmem:[#allocation3 + $0x8] sm:$0xff] %vm345_vm1, %v1804_v19 }
  0x53   : > { %364 = vst.msk [vmem:[#allocation3 + $0x10] sm:$0xff] %vm345_vm1, %v1804_v19 }
  0x54   : > { %365 = vst.msk [vmem:[#allocation3 + $0x18] sm:$0xff] %vm345_vm1, %v1804_v19 }
  0x55   : > { %366 = vst.msk [vmem:[#allocation3 + $0x20] sm:$0xff] %vm345_vm1, %v1804_v19 }
  0x56   : > { %367 = vst.msk [vmem:[#allocation3 + $0x28] sm:$0xff] %vm345_vm1, %v1804_v19 }
  0x57   : > { %1571 = vmatmul.msk.f32.gmra.mxu2 %vm378_vm0, %v417_v25  ;;  %1566 = vmatmul.msk.f32.gmra.mxu0 %vm378_vm0, %v412_v26  ;;  %368 = vst.msk [vmem:[#allocation3 + $0x30] sm:$0xff] %vm345_vm1, %v1804_v19  ;;  %v2084_v25 = vld [vmem:[#allocation2 + $0x60] sm:$0xff] }
  0x58   : > { %1578 = vmatmul.msk.f32.gmra.mxu3 %vm378_vm0, %v424_v27  ;;  %369 = vst.msk [vmem:[#allocation3 + $0x38] sm:$0xff] %vm345_vm1, %v1804_v19 }
  0x59   : > { %370 = vst.msk [vmem:[#allocation3 + $0x40] sm:$0xff] %vm345_vm1, %v1804_v19 }
  0x5a   : > { %371 = vst.msk [vmem:[#allocation3 + $0x48] sm:$0xff] %vm345_vm1, %v1804_v19 }
  0x5b   : > { %372 = vst.msk [vmem:[#allocation3 + $0x50] sm:$0xff] %vm345_vm1, %v1804_v19 }
  0x5c   : > { %373 = vst.msk [vmem:[#allocation3 + $0x58] sm:$0xff] %vm345_vm1, %v1804_v19 }
  0x5d   : > { %374 = vst.msk [vmem:[#allocation3 + $0x60] sm:$0xff] %vm345_vm1, %v1804_v19 }
  0x5e   : > { %375 = vst.msk [vmem:[#allocation3 + $0x68] sm:$0xff] %vm345_vm1, %v1804_v19 }
  0x5f   : > { %1572 = vmatmul.msk.f32.gmra.mxu2 %vm378_vm0, %v418_v31  ;;  %1567 = vmatmul.msk.f32.gmra.mxu0 %vm378_vm0, %v413_v32  ;;  %376 = vst.msk [vmem:[#allocation3 + $0x70] sm:$0xff] %vm345_vm1, %v1804_v19  ;;  %v2105_v31 = vld [vmem:[#allocation2 + $0x68] sm:$0xff] }
  0x60   : > { %1579 = vmatmul.msk.f32.gmra.mxu3 %vm378_vm0, %v425_v33  ;;  %377 = vst.msk [vmem:[#allocation3 + $0x78] sm:$0xff] %vm345_vm1, %v1804_v19  ;;  %v2108_v32 = vld [vmem:[#allocation2 + $0x8] sm:$0xff] }
  0x61   : > { %379 = vst.msk [vmem:[#allocation4] sm:$0xff] %vm378_vm0, %v1804_v19 }
  0x62   : > { %381 = vst.msk [vmem:[#allocation4 + $0x10] sm:$0xff] %vm378_vm0, %v1804_v19 }
  0x63   : > { %382 = vst.msk [vmem:[#allocation4 + $0x18] sm:$0xff] %vm378_vm0, %v1804_v19 }
  0x64   : > { %383 = vst.msk [vmem:[#allocation4 + $0x20] sm:$0xff] %vm378_vm0, %v1804_v19 }
  0x65   : > { %384 = vst.msk [vmem:[#allocation4 + $0x28] sm:$0xff] %vm378_vm0, %v1804_v19 }
  0x66   : > { %385 = vst.msk [vmem:[#allocation4 + $0x30] sm:$0xff] %vm378_vm0, %v1804_v19 }
  0x67   : > { %1573 = vmatmul.msk.f32.gmra.mxu2 %vm378_vm0, %v419_v37  ;;  %1568 = vmatmul.msk.f32.gmra.mxu0 %vm378_vm0, %v414_v38  ;;  %386 = vst.msk [vmem:[#allocation4 + $0x38] sm:$0xff] %vm378_vm0, %v1804_v19  ;;  %v2125_v37 = vld [vmem:[#allocation2 + $0x70] sm:$0xff] }
  0x68   : > { %1580 = vmatmul.msk.f32.gmra.mxu3 %vm378_vm0, %v426_v39  ;;  %387 = vst.msk [vmem:[#allocation4 + $0x40] sm:$0xff] %vm378_vm0, %v1804_v19  ;;  %v611_v38 = vld [vmem:[#allocation2 + $0x10] sm:$0xff] }
  0x69   : > { %388 = vst.msk [vmem:[#allocation4 + $0x48] sm:$0xff] %vm378_vm0, %v1804_v19  ;;  %v2127_v39 = vld [vmem:[#allocation2 + $0x30] sm:$0xff] }
  0x6a   : > { %389 = vst.msk [vmem:[#allocation4 + $0x50] sm:$0xff] %vm378_vm0, %v1804_v19 }
  0x6b   : > { %390 = vst.msk [vmem:[#allocation4 + $0x58] sm:$0xff] %vm378_vm0, %v1804_v19 }
  0x6c   : > { %391 = vst.msk [vmem:[#allocation4 + $0x60] sm:$0xff] %vm378_vm0, %v1804_v19 }
  0x6d   : > { %392 = vst.msk [vmem:[#allocation4 + $0x68] sm:$0xff] %vm378_vm0, %v1804_v19 }
  0x6e   : > { %393 = vst.msk [vmem:[#allocation4 + $0x70] sm:$0xff] %vm378_vm0, %v1804_v19 }
  0x6f   : > { %1569 = vmatmul.msk.f32.gmra.mxu0 %vm378_vm0, %v415_v42  ;;  %1574 = vmatmul.msk.f32.gmra.mxu2 %vm378_vm0, %v420_v43  ;;  %394 = vst.msk [vmem:[#allocation4 + $0x78] sm:$0xff] %vm378_vm0, %v1804_v19  ;;  %v2170_v19 = vld [vmem:[#allocation2 + $0x50] sm:$0xff] }
  0x77   : > { %1575 = vmatmul.msk.f32.gmra.mxu2 %vm378_vm0, %v421_v45 }
  0x7f   : > { %1576 = vmatmul.msk.f32.gmra.mxu2 %vm378_vm0, %v422_v47  ;;  %v2142_v47 = vld [vmem:[#allocation2 + $0x40] sm:$0xff] }
  0xcc   : > { %v561_v49 = vpop.f32.mrf.mxu0 }
  0xcd   : > { %v1973_v50 = vadd.f32 %v1970_v48, %v561_v49  ;;  %v2144_v49 = vld [vmem:[#allocation2 + $0x78] sm:$0xff] }
  0xcf   : > { %625 = vmax.xlane.f32.xlu0 %v1973_v50 }
  0xd2   : > { %v576_v51 = vpop.f32.mrf.mxu2 }
  0xd3   : > { %v1977_v52 = vadd.f32 %v1970_v48, %v576_v51  ;;  %v597_v53 = vpop.f32.mrf.mxu3 }
  0xd4   : > { %v564_v54 = vpop.f32.mrf.mxu0  ;;  %v1980_v55 = vadd.f32 %v1970_v48, %v597_v53 }
  0xd5   : > { %635 = vmax.xlane.f32.xlu2 %v1977_v52  ;;  %v1988_v60 = vadd.f32 %v1970_v48, %v564_v54 }
  0xd7   : > { %649 = vmax.xlane.f32.xlu0 %v1980_v55 }
  0xda   : > { %v579_v56 = vpop.f32.mrf.mxu2 }
  0xdb   : > { %v600_v57 = vpop.f32.mrf.mxu3  ;;  %v1999_v1 = vadd.f32 %v1970_v48, %v579_v56 }
  0xdc   : > { %v1985_v58 = vadd.f32 %v1970_v48, %v600_v57  ;;  %v567_v59 = vpop.f32.mrf.mxu0 }
  0xdd   : > { %v1993_v61 = vadd.f32 %v1970_v48, %v567_v59 }
  0xde   : > { %651 = vmax.xlane.f32.xlu1 %v1985_v58 }
  0xdf   : > { %627 = vmax.xlane.f32.xlu0 %v1988_v60 }
  0xe2   : > { %v582_v62 = vpop.f32.mrf.mxu2 }
  0xe3   : > { %v603_v63 = vpop.f32.mrf.mxu3  ;;  %v2014_v7 = vadd.f32 %v1970_v48, %v582_v62 }
  0xe4   : > { %v1996_v0 = vadd.f32 %v1970_v48, %v603_v63  ;;  %v570_v2 = vpop.f32.mrf.mxu0  ;;  %v613_v63 = vld [vmem:[#allocation2 + $0x20] sm:$0xff] }
  0xe5   : > { %v2037_v13 = vadd.f32 %v1970_v48, %v570_v2  ;;  %v612_v2 = vld [vmem:[#allocation2 + $0x18] sm:$0xff] }
  0xe6   : > { %653 = vmax.xlane.f32.xlu2 %v1996_v0  ;;  %629 = vmax.xlane.f32.xlu1 %v1993_v61 }
  0xe7   : > { %637 = vmax.xlane.f32.xlu0 %v1999_v1 }
  0xea   : > { %v585_v4 = vpop.f32.mrf.mxu2 }
  0xeb   : > { %v2010_v5 = vadd.f32 %v1970_v48, %v585_v4  ;;  %v606_v6 = vpop.f32.mrf.mxu3 }
  0xec   : > { %v2017_v8 = vadd.f32 %v1970_v48, %v606_v6  ;;  %v573_v9 = vpop.f32.mrf.mxu0  ;;  %v2160_v6 = vld [vmem:[#allocation2 + $0x48] sm:$0xff] }
  0xed   : > { %v2029_v10 = vadd.f32 %v1970_v48, %v573_v9 }
  0xee   : > { %641 = vmax.xlane.f32.xlu2 %v2010_v5  ;;  %639 = vmax.xlane.f32.xlu1 %v2014_v7 }
  0xef   : > { %655 = vmax.xlane.f32.xlu0 %v2017_v8 }
  0xf2   : > { %v588_v11 = vpop.f32.mrf.mxu2 }
  0xf3   : > { %v2033_v12 = vadd.f32 %v1970_v48, %v588_v11 }
  0xf6   : > { %633 = vmax.xlane.f32.xlu2 %v2029_v10  ;;  %631 = vmax.xlane.f32.xlu1 %v2037_v13 }
  0xf7   : > { %643 = vmax.xlane.f32.xlu0 %v2033_v12 }
  0xfa   : > { %v591_v14 = vpop.f32.mrf.mxu2 }
  0xfb   : > { %v2045_v15 = vadd.f32 %v1970_v48, %v591_v14 }
  0xfe   : > { %645 = vmax.xlane.f32.xlu1 %v2045_v15 }
 0x102   : > { %v594_v16 = vpop.f32.mrf.mxu2 }
 0x103   : > { %v2049_v17 = vadd.f32 %v1970_v48, %v594_v16  ;;  %v616_v48 = vld [vmem:[#allocation2 + $0x38] sm:$0xff] }
 0x105   : > { %647 = vmax.xlane.f32.xlu2 %v2049_v17 }
 0x142   : > { %v626_v21 = vpop.xlane.xlu0 %625 }
 0x143   : > { %v2073_v22 = vmax.f32 %v2067_v20, %v626_v21 }
 0x145   : > { %1171 = vst.msk [vmem:[#allocation2] sm:$0xff] %vm345_vm1, %v2073_v22  ;;  %723 = vperm.xlu1 %1678, %v2073_v22  }
 0x148   : > { %v636_v24 = vpop.xlane.xlu2 %635 }
 0x149   : > { %v2088_v26 = vmax.f32 %v2080_v23, %v636_v24 }
 0x14a   : > { %v650_v27 = vpop.xlane.xlu0 %649 }
 0x14b   : > { %v678_v28 = vsub.f32 %v2080_v23, %v2088_v26  ;;  %1176 = vst.msk [vmem:[#allocation2 + $0x28] sm:$0xff] %vm345_vm1, %v2088_v26  ;;  %v2097_v29 = vmax.f32 %v2084_v25, %v650_v27  ;;  %v953_v23 = vld [vmem:[%s2199_s7 + $0x38] sm:$0xff] }
 0x14d   : > { %v685_v30 = vsub.f32 %v2084_v25, %v2097_v29  ;;  %1183 = vst.msk [vmem:[#allocation2 + $0x60] sm:$0xff] %vm345_vm1, %v2097_v29 }
 0x151   : > { %v652_v33 = vpop.xlane.xlu1 %651 }
 0x152   : > { %v2113_v34 = vmax.f32 %v2105_v31, %v652_v33  ;;  %v628_v35 = vpop.xlane.xlu0 %627 }
 0x153   : > { %v2117_v36 = vmax.f32 %v2108_v32, %v628_v35 }
 0x154   : > { %1184 = vst.msk [vmem:[#allocation2 + $0x68] sm:$0xff] %vm345_vm1, %v2113_v34 }
 0x155   : > { %1172 = vst.msk [vmem:[#allocation2 + $0x8] sm:$0xff] %vm345_vm1, %v2117_v36  ;;  %728 = vperm.xlu2 %1679, %v2117_v36  }
 0x159   : > { %v654_v40 = vpop.xlane.xlu2 %653  ;;  %v630_v41 = vpop.xlane.xlu1 %629 }
 0x15a   : > { %v2130_v42 = vmax.f32 %v2125_v37, %v654_v40  ;;  %v659_v43 = vmax.f32 %v611_v38, %v630_v41  ;;  %v638_v44 = vpop.xlane.xlu0 %637  ;;  %v673_v40 = vsub.f32 %v2067_v20, %v2073_v22  ;;  %v674_v41 = vsub.f32 %v2108_v32, %v2117_v36  ;;  %v961_v36 = vld [vmem:[%s2199_s7 + $0x78] sm:$0xff] }
 0x15b   : > { %v2133_v45 = vmax.f32 %v2127_v39, %v638_v44  ;;  %1074 = vmatpush.msrb.mxu0 %v961_v36  ;;  %1619 = vmatpush.msra.mxu1 %v961_v36 }
 0x15c   : > { %v687_v46 = vsub.f32 %v2125_v37, %v2130_v42  ;;  %1185 = vst.msk [vmem:[#allocation2 + $0x70] sm:$0xff] %vm345_vm1, %v2130_v42  ;;  %733 = vperm.xlu0 %1680, %v659_v43   ;;  %v675_v18 = vsub.f32 %v611_v38, %v659_v43  ;;  %v691_v20 = vmul.f32 1.442695, %v674_v41  ;;  %1620 = vmatpush.msrb.mxu3 %v961_v36  ;;  %v948_v36 = vld [vmem:[%s2199_s7 + $0x10] sm:$0xff] }
 0x15d   : > { %1173 = vst.msk [vmem:[#allocation2 + $0x10] sm:$0xff] %vm345_vm1, %v659_v43  ;;  %v2188_v43 = vld [vmem:[#allocation2 + $0x58] sm:$0xff] }
 0x15e   : > { %1177 = vst.msk [vmem:[#allocation2 + $0x30] sm:$0xff] %vm345_vm1, %v2133_v45  ;;  %v693_v24 = vmul.f32 1.442695, %v675_v18  ;;  %v957_v18 = vld [vmem:[%s2199_s7 + $0x58] sm:$0xff] }
 0x160   : > { %1682 = vpow2.f32 %v693_v24  ;;  %v679_v24 = vsub.f32 %v2127_v39, %v2133_v45 }
 0x161   : > { %v642_v51 = vpop.xlane.xlu2 %641  ;;  %v640_v53 = vpop.xlane.xlu1 %639 }
 0x162   : > { %v2147_v54 = vmax.f32 %v2142_v47, %v642_v51  ;;  %v664_v56 = vmax.f32 %v616_v48, %v640_v53  ;;  %v656_v57 = vpop.xlane.xlu0 %655 }
 0x163   : > { %v2150_v59 = vmax.f32 %v2144_v49, %v656_v57  ;;  %v689_v57 = vmul.f32 1.442695, %v673_v40  ;;  %v955_v40 = vld [vmem:[%s2199_s7 + $0x48] sm:$0xff] }
 0x164   : > { %1179 = vst.msk [vmem:[#allocation2 + $0x40] sm:$0xff] %vm345_vm1, %v2147_v54  ;;  %783 = vperm.xlu0 %1680, %v2097_v29   ;;  %v680_v51 = vsub.f32 %v616_v48, %v664_v56  ;;  %v960_v48 = vld [vmem:[%s2199_s7 + $0x70] sm:$0xff] }
 0x165   : > { %1178 = vst.msk [vmem:[#allocation2 + $0x38] sm:$0xff] %vm345_vm1, %v664_v56  ;;  %v688_v62 = vsub.f32 %v2144_v49, %v2150_v59  ;;  %1075 = vmatpush.msrb.mxu0 %v960_v48  ;;  %1621 = vmatpush.msra.mxu1 %v960_v48 }
 0x166   : > { %1186 = vst.msk [vmem:[#allocation2 + $0x78] sm:$0xff] %vm345_vm1, %v2150_v59  ;;  %v2180_v38 = vpop.eup %1682  ;;  %v703_v22 = vmul.f32 1.442695, %v680_v51  ;;  %1622 = vmatpush.msrb.mxu3 %v960_v48  ;;  %v951_v51 = vld [vmem:[%s2199_s7 + $0x28] sm:$0xff]  ;;  %v717_v48 = vmul.f32 1.442695, %v687_v46 }
 0x167   : > { %v719_v25 = vmul.f32 1.442695, %v688_v62 }
 0x169   : > { %v634_v3 = vpop.xlane.xlu2 %633  ;;  %v632_v4 = vpop.xlane.xlu1 %631 }
 0x16a   : > { %v661_v9 = vmax.f32 %v613_v63, %v634_v3  ;;  %v660_v11 = vmax.f32 %v612_v2, %v632_v4  ;;  %v644_v14 = vpop.xlane.xlu0 %643  ;;  %v959_v3 = vld [vmem:[%s2199_s7 + $0x68] sm:$0xff]  ;;  %v958_v4 = vld [vmem:[%s2199_s7 + $0x60] sm:$0xff] }
 0x16b   : > { %v2164_v16 = vmax.f32 %v2160_v6, %v644_v14  ;;  %1076 = vmatpush.msrb.mxu0 %v959_v3  ;;  %1623 = vmatpush.msra.mxu1 %v959_v3 }
 0x16c   : > { %1175 = vst.msk [vmem:[#allocation2 + $0x20] sm:$0xff] %vm345_vm1, %v661_v9  ;;  %743 = vperm.xlu1 %1678, %v661_v9   ;;  %738 = vperm.xlu2 %1679, %v660_v11   ;;  %v677_v33 = vsub.f32 %v613_v63, %v661_v9  ;;  %v686_v63 = vsub.f32 %v2105_v31, %v2113_v34 }
 0x16d   : > { %1174 = vst.msk [vmem:[#allocation2 + $0x18] sm:$0xff] %vm345_vm1, %v660_v11  ;;  %798 = vperm.xlu0 %1680, %v2150_v59   ;;  %1624 = vmatpush.msrb.mxu3 %v959_v3  ;;  %v946_v3 = vld [vmem:[%s2199_s7] sm:$0xff] }
 0x16e   : > { %1180 = vst.msk [vmem:[#allocation2 + $0x48] sm:$0xff] %vm345_vm1, %v2164_v16  ;;  %v697_v35 = vmul.f32 1.442695, %v677_v33  ;;  %1077 = vmatpush.msrb.mxu0 %v958_v4  ;;  %1625 = vmatpush.msra.mxu1 %v958_v4  ;;  %v699_v33 = vmul.f32 1.442695, %v678_v28  ;;  %v952_v28 = vld [vmem:[%s2199_s7 + $0x30] sm:$0xff] }
 0x16f   : > { %1626 = vmatpush.msrb.mxu3 %v958_v4 }
 0x170   : > { %1684 = vpow2.f32 %v697_v35  ;;  %1078 = vmatpush.msrb.mxu0 %v957_v18  ;;  %1627 = vmatpush.msra.mxu1 %v957_v18  ;;  %v701_v35 = vmul.f32 1.442695, %v679_v24 }
 0x171   : > { %v646_v21 = vpop.xlane.xlu1 %645  ;;  %1686 = vpow2.f32 %v689_v57  ;;  %1628 = vmatpush.msrb.mxu3 %v957_v18 }
 0x172   : > { %v2173_v27 = vmax.f32 %v2170_v19, %v646_v21  ;;  %1688 = vpow2.f32 %v691_v20  ;;  %v956_v21 = vld [vmem:[%s2199_s7 + $0x50] sm:$0xff]  ;;  %v949_v20 = vld [vmem:[%s2199_s7 + $0x18] sm:$0xff] }
 0x173   : > { %1690 = vpow2.f32 %v703_v22  ;;  %1079 = vmatpush.msrb.mxu0 %v956_v21  ;;  %1629 = vmatpush.msra.mxu1 %v956_v21  ;;  %v682_v22 = vsub.f32 %v2160_v6, %v2164_v16 }
 0x174   : > { %748 = vperm.xlu2 %1679, %v2088_v26   ;;  %753 = vperm.xlu1 %1678, %v2133_v45   ;;  %1181 = vst.msk [vmem:[#allocation2 + $0x50] sm:$0xff] %vm345_vm1, %v2173_v27  ;;  %v954_v45 = vld [vmem:[%s2199_s7 + $0x40] sm:$0xff]  ;;  %v681_v26 = vsub.f32 %v2142_v47, %v2147_v54 }
 0x175   : > { %768 = vperm.xlu0 %1680, %v2164_v16   ;;  %1080 = vmatpush.msrb.mxu0 %v955_v40 }
 0x176   : > { %v2201_v32 = vpop.eup %1684  ;;  %1630 = vmatpush.msrb.mxu3 %v956_v21  ;;  %1631 = vmatpush.msra.mxu1 %v955_v40 }
 0x177   : > { %v2212_v14 = vpop.eup %1686  ;;  %1081 = vmatpush.msrb.mxu0 %v954_v45 }
 0x178   : > { %v648_v44 = vpop.xlane.xlu2 %647  ;;  %1632 = vmatpush.msrb.mxu3 %v955_v40  ;;  %1633 = vmatpush.msra.mxu1 %v954_v45 }
 0x179   : > { %v2191_v53 = vmax.f32 %v2188_v43, %v648_v44  ;;  %1082 = vmatpush.msrb.mxu0 %v953_v23  ;;  %v705_v44 = vmul.f32 1.442695, %v681_v26 }
 0x17a   : > { %1634 = vmatpush.msrb.mxu3 %v954_v45  ;;  %1635 = vmatpush.msra.mxu1 %v953_v23 }
 0x17b   : > { %1182 = vst.msk [vmem:[#allocation2 + $0x58] sm:$0xff] %vm345_vm1, %v2191_v53  ;;  %1083 = vmatpush.msrb.mxu0 %v952_v28  ;;  %v684_v37 = vsub.f32 %v2188_v43, %v2191_v53 }
 0x17c   : > { %758 = vperm.xlu2 %1679, %v664_v56   ;;  %763 = vperm.xlu1 %1678, %v2147_v54   ;;  %v676_v56 = vsub.f32 %v612_v2, %v660_v11  ;;  %v715_v2 = vmul.f32 1.442695, %v686_v63  ;;  %v2214_v11 = vpop.eup %1688  ;;  %v950_v54 = vld [vmem:[%s2199_s7 + $0x20] sm:$0xff]  ;;  %v707_v63 = vmul.f32 1.442695, %v682_v22 }
 0x17d   : > { %990 = vperm.xlu0 %1680, %v2180_v38   ;;  %v2216_v31 = vpop.eup %1690  ;;  %1636 = vmatpush.msrb.mxu3 %v953_v23  ;;  %v711_v46 = vmul.f32 1.442695, %v684_v37 }
 0x17e   : > { %v695_v9 = vmul.f32 1.442695, %v676_v56  ;;  %1084 = vmatpush.msrb.mxu0 %v951_v51  ;;  %1637 = vmatpush.msra.mxu1 %v952_v28  ;;  %v947_v56 = vld [vmem:[%s2199_s7 + $0x8] sm:$0xff] }
 0x17f   : > { %1638 = vmatpush.msrb.mxu3 %v952_v28 }
 0x180   : > { %1692 = vpow2.f32 %v695_v9  ;;  %1085 = vmatpush.msrb.mxu0 %v950_v54  ;;  %1639 = vmatpush.msra.mxu1 %v951_v51 }
 0x181   : > { %1694 = vpow2.f32 %v715_v2  ;;  %1640 = vmatpush.msrb.mxu3 %v951_v51 }
 0x182   : > { %1696 = vpow2.f32 %v699_v33  ;;  %1086 = vmatpush.msrb.mxu0 %v949_v20  ;;  %1641 = vmatpush.msra.mxu1 %v950_v54 }
 0x183   : > { %1642 = vmatpush.msrb.mxu3 %v950_v54 }
 0x184   : > { %788 = vperm.xlu2 %1679, %v2113_v34   ;;  %793 = vperm.xlu1 %1678, %v2130_v42   ;;  %v683_v34 = vsub.f32 %v2170_v19, %v2173_v27  ;;  %v713_v42 = vmul.f32 1.442695, %v685_v30 }
 0x185   : > { %1000 = vperm.xlu0 %1680, %v2201_v32   ;;  %1087 = vmatpush.msrb.mxu0 %v948_v36 }
 0x186   : > { %v709_v19 = vmul.f32 1.442695, %v683_v34  ;;  %v2231_v39 = vpop.eup %1692  ;;  %1643 = vmatpush.msra.mxu1 %v949_v20  ;;  %1644 = vmatpush.msrb.mxu3 %v949_v20 }
 0x187   : > { %v2234_v41 = vpop.eup %1694  ;;  %1088 = vmatpush.msrb.mxu0 %v947_v56 }
 0x188   : > { %1698 = vpow2.f32 %v709_v19  ;;  %1645 = vmatpush.msra.mxu1 %v948_v36  ;;  %1646 = vmatpush.msrb.mxu3 %v948_v36 }
 0x189   : > { %1700 = vpow2.f32 %v701_v35  ;;  %1089 = vmatpush.msrb.mxu0 %v946_v3 }
 0x18a   : > { %1702 = vpow2.f32 %v705_v44  ;;  %1647 = vmatpush.msra.mxu1 %v947_v56  ;;  %1648 = vmatpush.msrb.mxu3 %v947_v56 }
 0x18b   : > { %1704 = vpow2.f32 %v717_v48 }
 0x18c   : > { %985 = vperm.xlu2 %1679, %v2214_v11   ;;  %980 = vperm.xlu1 %1678, %v2212_v14   ;;  %1706 = vpow2.f32 %v707_v63 }
 0x18d   : > { %1015 = vperm.xlu0 %1680, %v2216_v31   ;;  %1649 = vmatpush.msra.mxu1 %v946_v3  ;;  %1708 = vpow2.f32 %v713_v42 }
 0x18e   : > { %1710 = vpow2.f32 %v711_v46  ;;  %1650 = vmatpush.msrb.mxu3 %v946_v3 }
 0x18f   : > { %1712 = vpow2.f32 %v719_v25 }
 0x194   : > { %773 = vperm.xlu2 %1679, %v2173_v27   ;;  %995 = vperm.xlu1 %1678, %v2231_v39   ;;  %v2243_v27 = vpop.eup %1696 }
 0x195   : > { %1045 = vperm.xlu0 %1680, %v2234_v41   ;;  %v2246_v57 = vpop.eup %1698 }
 0x196   : > { %v2248_v47 = vpop.eup %1700 }
 0x197   : > { %v2263_v6 = vpop.eup %1702 }
 0x198   : > { %v2272_v16 = vpop.eup %1704 }
 0x199   : > { %v2274_v4 = vpop.eup %1706 }
 0x19a   : > { %v2281_v29 = vpop.eup %1708 }
 0x19b   : > { %v2283_v30 = vpop.eup %1710 }
 0x19c   : > { %1005 = vperm.xlu2 %1679, %v2243_v27   ;;  %1010 = vperm.xlu1 %1678, %v2248_v47   ;;  %v2288_v34 = vpop.eup %1712 }
 0x19d   : > { %1030 = vperm.xlu0 %1680, %v2246_v57  }
 0x1a4   : > { %1020 = vperm.xlu2 %1679, %v2263_v6   ;;  %778 = vperm.xlu1 %1678, %v2191_v53  }
 0x1ac   : > { %1050 = vperm.xlu2 %1679, %v2272_v16   ;;  %1025 = vperm.xlu1 %1678, %v2274_v4  }
 0x1af   : > { %v729_v9 = vpop.permute.xlu2 %728 }
 0x1b0   : > { %v802_v18 = vsub.f32 %v1988_v60, %v729_v9 }
 0x1b2   : > { %v819_v49 = vmul.f32 1.442695, %v802_v18 }
 0x1b4   : > { %1035 = vperm.xlu2 %1679, %v2283_v30   ;;  %1040 = vperm.xlu1 %1678, %v2281_v29  }
 0x1b7   : > { %v724_v43 = vpop.permute.xlu1 %723 }
 0x1b8   : > { %v801_v53 = vsub.f32 %v1973_v50, %v724_v43 }
 0x1ba   : > { %v817_v2 = vmul.f32 1.442695, %v801_v53 }
 0x1bc   : > { %1714 = vpow2.f32 %v817_v2  ;;  %1055 = vperm.xlu1 %1678, %v2288_v34  }
 0x1bd   : > { %1716 = vpow2.f32 %v819_v49 }
 0x1c2   : > { %v1715_v59 = vpop.eup %1714 }
 0x1c3   : > { %1090 = vmatmul.f32.vlgmr.msrb.gmra.mxu0 %v1715_v59  ;;  %v1717_v21 = vpop.eup %1716 }
 0x1c6   : > { %v739_v62 = vpop.permute.xlu2 %738 }
 0x1c7   : > { %v804_v35 = vsub.f32 %v2037_v13, %v739_v62 }
 0x1c9   : > { %v823_v23 = vmul.f32 1.442695, %v804_v35 }
 0x1cb   : > { %1093 = vmatmul.f32.gmra.mxu0 %v1717_v21 }
 0x1ce   : > { %v749_v24 = vpop.permute.xlu2 %748  ;;  %v734_v33 = vpop.permute.xlu0 %733 }
 0x1cf   : > { %v803_v50 = vsub.f32 %v1993_v61, %v734_v33  ;;  %v806_v60 = vsub.f32 %v1977_v52, %v749_v24 }
 0x1d1   : > { %v821_v19 = vmul.f32 1.442695, %v803_v50  ;;  %v827_v51 = vmul.f32 1.442695, %v806_v60 }
 0x1d3   : > { %1718 = vpow2.f32 %v821_v19 }
 0x1d4   : > { %1720 = vpow2.f32 %v823_v23 }
 0x1d6   : > { %v759_v40 = vpop.permute.xlu2 %758  ;;  %v784_v45 = vpop.permute.xlu0 %783 }
 0x1d7   : > { %v813_v26 = vsub.f32 %v1980_v55, %v784_v45 }
 0x1d9   : > { %v841_v28 = vmul.f32 1.442695, %v813_v26  ;;  %v1719_v44 = vpop.eup %1718 }
 0x1da   : > { %1096 = vmatmul.f32.vlgmr.msra.gmra.mxu1 %v1719_v44  ;;  %v2298_v52 = vpop.eup %1720 }
 0x1db   : > { %1722 = vpow2.f32 %v841_v28 }
 0x1dc   : > { %1724 = vpow2.f32 %v827_v51 }
 0x1dd   : > { %881 = vadd.xlane.f32.xlu2 %v1715_v59 }
 0x1de   : > { %v744_v61 = vpop.permute.xlu1 %743  ;;  %v789_v54 = vpop.permute.xlu2 %788 }
 0x1df   : > { %v805_v13 = vsub.f32 %v2029_v10, %v744_v61  ;;  %v814_v20 = vsub.f32 %v1985_v58, %v789_v54  ;;  %v808_v10 = vsub.f32 %v2014_v7, %v759_v40  ;;  %v799_v25 = vpop.permute.xlu0 %798 }
 0x1e0   : > { %v816_v7 = vsub.f32 %v2017_v8, %v799_v25  ;;  %v849_v25 = vld [vmem:[#allocation3] sm:$0xff] }
 0x1e1   : > { %v825_v22 = vmul.f32 1.442695, %v805_v13  ;;  %v843_v36 = vmul.f32 1.442695, %v814_v20  ;;  %v2300_v48 = vpop.eup %1722  ;;  %v831_v46 = vmul.f32 1.442695, %v808_v10 }
 0x1e2   : > { %1099 = vmatmul.f32.gmra.mxu1 %v2298_v52  ;;  %905 = vadd.xlane.f32.xlu0 %v2300_v48  ;;  %v1725_v55 = vpop.eup %1724  ;;  %v847_v59 = vmul.f32 1.442695, %v816_v7  ;;  %v963_v10 = vld [vmem:[#allocation4 + $0x8] sm:$0xff] }
 0x1e3   : > { %1726 = vpow2.f32 %v825_v22 }
 0x1e4   : > { %1728 = vpow2.f32 %v843_v36 }
 0x1e5   : > { %891 = vadd.xlane.f32.xlu2 %v1725_v55 }
 0x1e6   : > { %v754_v56 = vpop.permute.xlu1 %753  ;;  %883 = vadd.xlane.f32.xlu1 %v1717_v21  ;;  %v2306_v42 = vpop.permute.xlu2 %985 }
 0x1e7   : > { %v807_v58 = vsub.f32 %v1999_v1, %v754_v56  ;;  %v769_v62 = vpop.permute.xlu0 %768 }
 0x1e8   : > { %v810_v24 = vsub.f32 %v2033_v12, %v769_v62 }
 0x1e9   : > { %v1727_v63 = vpop.eup %1726  ;;  %v829_v3 = vmul.f32 1.442695, %v807_v58 }
 0x1ea   : > { %v1729_v37 = vpop.eup %1728  ;;  %1102 = vmatmul.f32.gmra.mxu1 %v1727_v63  ;;  %v835_v19 = vmul.f32 1.442695, %v810_v24 }
 0x1eb   : > { %1730 = vpow2.f32 %v829_v3  ;;  %1129 = vmatmul.f32.vlgmr.msrb.gmra.mxu3 %v1729_v37 }
 0x1ec   : > { %1732 = vpow2.f32 %v831_v46 }
 0x1ee   : > { %v764_v43 = vpop.permute.xlu1 %763  ;;  %907 = vadd.xlane.f32.xlu1 %v1729_v37  ;;  %v774_v9 = vpop.permute.xlu2 %773 }
 0x1ef   : > { %v811_v18 = vsub.f32 %v2045_v15, %v774_v9  ;;  %v809_v8 = vsub.f32 %v2010_v5, %v764_v43  ;;  %v991_v51 = vpop.permute.xlu0 %990 }
 0x1f1   : > { %v1731_v53 = vpop.eup %1730  ;;  %v837_v33 = vmul.f32 1.442695, %v811_v18  ;;  %v833_v35 = vmul.f32 1.442695, %v809_v8  ;;  %v854_v18 = vld [vmem:[#allocation3 + $0x28] sm:$0xff] }
 0x1f2   : > { %893 = vadd.xlane.f32.xlu0 %v1731_v53  ;;  %1105 = vmatmul.f32.gmra.mxu1 %v1725_v55  ;;  %v1733_v1 = vpop.eup %1732 }
 0x1f6   : > { %v794_v2 = vpop.permute.xlu1 %793  ;;  %895 = vadd.xlane.f32.xlu1 %v1733_v1  ;;  %v2319_v61 = vpop.permute.xlu2 %1005 }
 0x1f7   : > { %v815_v49 = vsub.f32 %v1996_v0, %v794_v2  ;;  %v2322_v54 = vpop.permute.xlu0 %1000  ;;  %v861_v2 = vld [vmem:[#allocation3 + $0x60] sm:$0xff] }
 0x1f9   : > { %v845_v21 = vmul.f32 1.442695, %v815_v49  ;;  %v877_v49 = vmul.f32 %v2281_v29, %v861_v2  ;;  %v965_v29 = vld [vmem:[#allocation4 + $0x18] sm:$0xff] }
 0x1fa   : > { %885 = vadd.xlane.f32.xlu0 %v1719_v44  ;;  %1108 = vmatmul.f32.gmra.mxu1 %v1731_v53  ;;  %v865_v53 = vmul.f32 %v2212_v14, %v849_v25 }
 0x1fb   : > { %1734 = vpow2.f32 %v845_v21 }
 0x1fc   : > { %1736 = vpow2.f32 %v847_v59  ;;  %v850_v59 = vld [vmem:[#allocation3 + $0x8] sm:$0xff] }
 0x1fd   : > { %1738 = vpow2.f32 %v837_v33  ;;  %v870_v33 = vmul.f32 %v2243_v27, %v854_v18  ;;  %v866_v14 = vmul.f32 %v2214_v11, %v850_v59  ;;  %v862_v27 = vld [vmem:[#allocation3 + $0x68] sm:$0xff] }
 0x1fe   : > { %v981_v50 = vpop.permute.xlu1 %980  ;;  %889 = vadd.xlane.f32.xlu1 %v1727_v63  ;;  %1740 = vpow2.f32 %v835_v19  ;;  %v2324_v13 = vpop.permute.xlu2 %1020  ;;  %v878_v11 = vmul.f32 %v2234_v41, %v862_v27 }
 0x1ff   : > { %1742 = vpow2.f32 %v833_v35  ;;  %v2326_v20 = vpop.permute.xlu0 %1015 }
 0x201   : > { %v1735_v15 = vpop.eup %1734 }
 0x202   : > { %v1737_v60 = vpop.eup %1736  ;;  %909 = vadd.xlane.f32.xlu2 %v1735_v15  ;;  %1132 = vmatmul.f32.gmra.mxu3 %v1735_v15 }
 0x203   : > { %1111 = vmatmul.f32.gmra.mxu1 %v1733_v1  ;;  %911 = vadd.xlane.f32.xlu0 %v1737_v60  ;;  %v1739_v0 = vpop.eup %1738 }
 0x204   : > { %v1741_v40 = vpop.eup %1740 }
 0x205   : > { %v1743_v45 = vpop.eup %1742 }
 0x206   : > { %v2313_v12 = vpop.permute.xlu1 %995  ;;  %901 = vadd.xlane.f32.xlu1 %v1739_v0 }
 0x207   : > { %v2333_v58 = vpop.permute.xlu0 %1045 }
 0x20a   : > { %887 = vadd.xlane.f32.xlu2 %v2298_v52  ;;  %1135 = vmatmul.f32.gmra.mxu3 %v1737_v60  ;;  %v962_v52 = vld [vmem:[#allocation4] sm:$0xff] }
 0x20b   : > { %1114 = vmatmul.f32.gmra.mxu1 %v1743_v45  ;;  %899 = vadd.xlane.f32.xlu0 %v1741_v40  ;;  %v1058_v36 = vmul.f32 %v981_v50, %v962_v52 }
 0x20e   : > { %v2316_v5 = vpop.permute.xlu1 %1010 }
 0x20f   : > { %v2341_v43 = vpop.permute.xlu0 %1030 }
 0x212   : > { %897 = vadd.xlane.f32.xlu2 %v1743_v45 }
 0x213   : > { %1117 = vmatmul.f32.gmra.mxu1 %v1741_v40  ;;  %v1061_v40 = vmul.f32 %v2313_v12, %v965_v29 }
 0x216   : > { %v779_v23 = vpop.permute.xlu1 %778 }
 0x217   : > { %v812_v26 = vsub.f32 %v2049_v17, %v779_v23  ;;  %v2330_v17 = vpop.permute.xlu2 %1050 }
 0x219   : > { %v839_v28 = vmul.f32 1.442695, %v812_v26 }
 0x21b   : > { %1744 = vpow2.f32 %v839_v28  ;;  %1120 = vmatmul.f32.gmra.mxu1 %v1739_v0 }
 0x21e   : > { %v2328_v22 = vpop.permute.xlu1 %1025 }
 0x21f   : > { %v2338_v3 = vpop.permute.xlu2 %1035 }
 0x221   : > { %v1745_v44 = vpop.eup %1744 }
 0x222   : > { %903 = vadd.xlane.f32.xlu2 %v1745_v44 }
 0x223   : > { %1123 = vmatmul.f32.gmra.mxu1 %v1745_v44 }
 0x226   : > { %v2336_v63 = vpop.permute.xlu1 %1040 }
 0x22b   : > { %1126 = vmatmul.f32.gmra.mxu1 %v2300_v48  ;;  %v1059_v48 = vmul.f32 %v2306_v42, %v963_v10  ;;  %v964_v42 = vld [vmem:[#allocation4 + $0x10] sm:$0xff] }
 0x22c   : > { %v1060_v21 = vmul.f32 %v991_v51, %v964_v42  ;;  %v855_v51 = vld [vmem:[#allocation3 + $0x30] sm:$0xff] }
 0x22d   : > { %v871_v10 = vmul.f32 %v2248_v47, %v855_v51  ;;  %v863_v51 = vld [vmem:[#allocation3 + $0x70] sm:$0xff] }
 0x22e   : > { %v2344_v9 = vpop.permute.xlu1 %1055 }
 0x240   : > { %v1091_v55 = vpop.f32.mrf.mxu0 }
 0x241   : > { %v1139_v56 = vadd.f32 %v1091_v55, %v1058_v36 }
 0x243   : > { %1155 = vst.msk [vmem:[#allocation4] sm:$0xff] %vm378_vm0, %v1139_v56  ;;  %v966_v56 = vld [vmem:[#allocation4 + $0x20] sm:$0xff] }
 0x248   : > { %v1094_v37 = vpop.f32.mrf.mxu0 }
 0x249   : > { %v1140_v46 = vadd.f32 %v1094_v37, %v1059_v48  ;;  %v856_v37 = vld [vmem:[#allocation3 + $0x38] sm:$0xff] }
 0x24a   : > { %v872_v2 = vmul.f32 %v2216_v31, %v856_v37 }
 0x24b   : > { %1156 = vst.msk [vmem:[#allocation4 + $0x8] sm:$0xff] %vm378_vm0, %v1140_v46 }
 0x250   : > { %v882_v7 = vpop.xlane.xlu2 %881 }
 0x251   : > { %v913_v1 = vadd.f32 %v882_v7, %v865_v53  ;;  %v1062_v7 = vmul.f32 %v2322_v54, %v966_v56  ;;  %v879_v56 = vmul.f32 %v2272_v16, %v863_v51 }
 0x253   : > { %930 = vst.msk [vmem:[#allocation3] sm:$0xff] %vm345_vm1, %v913_v1 }
 0x255   : > { %v906_v62 = vpop.xlane.xlu0 %905 }
 0x256   : > { %v925_v24 = vadd.f32 %v906_v62, %v877_v49  ;;  %v851_v49 = vld [vmem:[#allocation3 + $0x10] sm:$0xff]  ;;  %v975_v62 = vld [vmem:[#allocation4 + $0x68] sm:$0xff] }
 0x257   : > { %v1097_v8 = vpop.f32.mrf.mxu1  ;;  %v867_v54 = vmul.f32 %v2180_v38, %v851_v49  ;;  %v1071_v31 = vmul.f32 %v2333_v58, %v975_v62 }
 0x258   : > { %v892_v50 = vpop.xlane.xlu2 %891  ;;  %942 = vst.msk [vmem:[#allocation3 + $0x60] sm:$0xff] %vm345_vm1, %v925_v24  ;;  %v1141_v19 = vadd.f32 %v1097_v8, %v1060_v21 }
 0x259   : > { %v918_v35 = vadd.f32 %v892_v50, %v870_v33  ;;  %v884_v15 = vpop.xlane.xlu1 %883  ;;  %v967_v50 = vld [vmem:[#allocation4 + $0x28] sm:$0xff] }
 0x25a   : > { %v914_v60 = vadd.f32 %v884_v15, %v866_v14  ;;  %v1190_v0 = vld [vmem:[#allocation3] sm:$0xff]  ;;  %1157 = vst.msk [vmem:[#allocation4 + $0x10] sm:$0xff] %vm378_vm0, %v1141_v19 }
 0x25b   : > { %1746 = vrcp.f32 %v1190_v0  ;;  %935 = vst.msk [vmem:[#allocation3 + $0x28] sm:$0xff] %vm345_vm1, %v918_v35  ;;  %v853_v15 = vld [vmem:[#allocation3 + $0x20] sm:$0xff] }
 0x25c   : > { %931 = vst.msk [vmem:[#allocation3 + $0x8] sm:$0xff] %vm345_vm1, %v914_v60 }
 0x25f   : > { %v1100_v45 = vpop.f32.mrf.mxu1  ;;  %v1202_v23 = vld [vmem:[#allocation3 + $0x60] sm:$0xff] }
 0x260   : > { %v1142_v28 = vadd.f32 %v1100_v45, %v1061_v40  ;;  %1748 = vrcp.f32 %v1202_v23  ;;  %v1063_v40 = vmul.f32 %v2319_v61, %v967_v50  ;;  %v864_v61 = vld [vmem:[#allocation3 + $0x78] sm:$0xff] }
 0x261   : > { %v1747_v26 = vpop.eup %1746  ;;  %v908_v44 = vpop.xlane.xlu1 %907 }
 0x262   : > { %v926_v52 = vadd.f32 %v908_v44, %v878_v11  ;;  %v1222_v36 = vmul.f32 %v1747_v26, %v1190_v0  ;;  %1158 = vst.msk [vmem:[#allocation4 + $0x18] sm:$0xff] %vm378_vm0, %v1142_v28  ;;  %v1195_v55 = vld [vmem:[#allocation3 + $0x28] sm:$0xff]  ;;  %v869_v28 = vmul.f32 %v2201_v32, %v853_v15 }
 0x263   : > { %1750 = vrcp.f32 %v1195_v55  ;;  %v1191_v48 = vld [vmem:[#allocation3 + $0x8] sm:$0xff] }
 0x264   : > { %943 = vst.msk [vmem:[#allocation3 + $0x68] sm:$0xff] %vm345_vm1, %v926_v52  ;;  %v1238_v12 = vsub.f32 2.0, %v1222_v36  ;;  %1752 = vrcp.f32 %v1191_v48 }
 0x265   : > { %v894_v41 = vpop.xlane.xlu0 %893 }
 0x266   : > { %v919_v46 = vadd.f32 %v894_v41, %v871_v10  ;;  %v1254_v25 = vmul.f32 %v1747_v26, %v1238_v12  ;;  %v1749_v53 = vpop.eup %1748  ;;  %v880_v10 = vmul.f32 %v2288_v34, %v864_v61  ;;  %v859_v12 = vld [vmem:[#allocation3 + $0x50] sm:$0xff]  ;;  %v852_v34 = vld [vmem:[#allocation3 + $0x18] sm:$0xff] }
 0x267   : > { %v1103_v1 = vpop.f32.mrf.mxu1  ;;  %v1234_v42 = vmul.f32 %v1749_v53, %v1202_v23 }
 0x268   : > { %936 = vst.msk [vmem:[#allocation3 + $0x30] sm:$0xff] %vm345_vm1, %v919_v46  ;;  %1288 = vperm.xlu0 %1680, %v1254_v25   ;;  %v1143_v18 = vadd.f32 %v1103_v1, %v1062_v7 }
 0x269   : > { %v896_v47 = vpop.xlane.xlu1 %895  ;;  %v1751_v59 = vpop.eup %1750  ;;  %v1250_v24 = vsub.f32 2.0, %v1234_v42 }
 0x26a   : > { %v920_v21 = vadd.f32 %v896_v47, %v872_v2  ;;  %v1753_v33 = vpop.eup %1752  ;;  %1159 = vst.msk [vmem:[#allocation4 + $0x20] sm:$0xff] %vm378_vm0, %v1143_v18  ;;  %v1227_v8 = vmul.f32 %v1751_v59, %v1195_v55  ;;  %v968_v55 = vld [vmem:[#allocation4 + $0x30] sm:$0xff]  ;;  %v875_v2 = vmul.f32 %v2246_v57, %v859_v12  ;;  %v868_v57 = vmul.f32 %v2231_v39, %v852_v34 }
 0x26b   : > { %v1223_v14 = vmul.f32 %v1753_v33, %v1191_v48  ;;  %v1266_v29 = vmul.f32 %v1749_v53, %v1250_v24  ;;  %v1064_v46 = vmul.f32 %v2316_v5, %v968_v55  ;;  %v969_v24 = vld [vmem:[#allocation4 + $0x38] sm:$0xff] }
 0x26c   : > { %937 = vst.msk [vmem:[#allocation3 + $0x38] sm:$0xff] %vm345_vm1, %v920_v21  ;;  %v1243_v35 = vsub.f32 2.0, %v1227_v8 }
 0x26d   : > { %v886_v19 = vpop.xlane.xlu0 %885  ;;  %v1239_v27 = vsub.f32 2.0, %v1223_v14 }
 0x26e   : > { %v1130_v60 = vpop.f32.mrf.mxu3  ;;  %v915_v0 = vadd.f32 %v886_v19, %v867_v54  ;;  %v1259_v11 = vmul.f32 %v1751_v59, %v1243_v35  ;;  %v858_v59 = vld [vmem:[#allocation3 + $0x48] sm:$0xff]  ;;  %v1065_v19 = vmul.f32 %v2326_v20, %v969_v24  ;;  %v972_v24 = vld [vmem:[#allocation4 + $0x50] sm:$0xff] }
 0x26f   : > { %v1152_v45 = vadd.f32 %v1130_v60, %v1071_v31  ;;  %v1196_v23 = vld [vmem:[#allocation3 + $0x30] sm:$0xff]  ;;  %v1106_v26 = vpop.f32.mrf.mxu1  ;;  %v1255_v38 = vmul.f32 %v1753_v33, %v1239_v27  ;;  %v874_v8 = vmul.f32 %v2274_v4, %v858_v59  ;;  %v857_v27 = vld [vmem:[#allocation3 + $0x40] sm:$0xff]  ;;  %v1203_v20 = vld [vmem:[#allocation3 + $0x68] sm:$0xff] }
 0x270   : > { %932 = vst.msk [vmem:[#allocation3 + $0x10] sm:$0xff] %vm345_vm1, %v915_v0  ;;  %1348 = vperm.xlu0 %1680, %v1266_v29   ;;  %1754 = vrcp.f32 %v1196_v23  ;;  %v1144_v58 = vadd.f32 %v1106_v26, %v1063_v40  ;;  %1313 = vperm.xlu1 %1678, %v1259_v11   ;;  %v976_v29 = vld [vmem:[#allocation4 + $0x70] sm:$0xff]  ;;  %v970_v26 = vld [vmem:[#allocation4 + $0x40] sm:$0xff] }
 0x271   : > { %1168 = vst.msk [vmem:[#allocation4 + $0x68] sm:$0xff] %vm378_vm0, %v1152_v45  ;;  %v890_v44 = vpop.xlane.xlu1 %889  ;;  %1293 = vperm.xlu2 %1679, %v1255_v38   ;;  %v1072_v38 = vmul.f32 %v2330_v17, %v976_v29  ;;  %v977_v17 = vld [vmem:[#allocation4 + $0x78] sm:$0xff] }
 0x272   : > { %v917_v52 = vadd.f32 %v890_v44, %v869_v28  ;;  %1160 = vst.msk [vmem:[#allocation4 + $0x28] sm:$0xff] %vm378_vm0, %v1144_v58  ;;  %v873_v28 = vmul.f32 %v2263_v6, %v857_v27  ;;  %v973_v27 = vld [vmem:[#allocation4 + $0x58] sm:$0xff] }
 0x273   : > { %v1197_v36 = vld [vmem:[#allocation3 + $0x38] sm:$0xff] }
 0x274   : > { %934 = vst.msk [vmem:[#allocation3 + $0x20] sm:$0xff] %vm345_vm1, %v917_v52  ;;  %1756 = vrcp.f32 %v1197_v36 }
 0x275   : > { %v910_v32 = vpop.xlane.xlu2 %909 }
 0x276   : > { %v1755_v48 = vpop.eup %1754  ;;  %v927_v41 = vadd.f32 %v910_v32, %v879_v56  ;;  %v912_v37 = vpop.xlane.xlu0 %911 }
 0x277   : > { %v928_v25 = vadd.f32 %v912_v37, %v880_v10  ;;  %v1228_v53 = vmul.f32 %v1755_v48, %v1196_v23  ;;  %v1192_v7 = vld [vmem:[#allocation3 + $0x10] sm:$0xff]  ;;  %v1109_v1 = vpop.f32.mrf.mxu1  ;;  %v971_v37 = vld [vmem:[#allocation4 + $0x48] sm:$0xff] }
 0x278   : > { %944 = vst.msk [vmem:[#allocation3 + $0x70] sm:$0xff] %vm345_vm1, %v927_v41  ;;  %1758 = vrcp.f32 %v1192_v7  ;;  %v1145_v16 = vadd.f32 %v1109_v1, %v1064_v46  ;;  %v1067_v1 = vmul.f32 %v2328_v22, %v971_v37 }
 0x279   : > { %945 = vst.msk [vmem:[#allocation3 + $0x78] sm:$0xff] %vm345_vm1, %v928_v25  ;;  %v902_v42 = vpop.xlane.xlu1 %901  ;;  %v1244_v18 = vsub.f32 2.0, %v1228_v53 }
 0x27a   : > { %v1757_v47 = vpop.eup %1756  ;;  %v923_v49 = vadd.f32 %v902_v42, %v875_v2  ;;  %1161 = vst.msk [vmem:[#allocation4 + $0x30] sm:$0xff] %vm378_vm0, %v1145_v16 }
 0x27b   : > { %v1260_v5 = vmul.f32 %v1755_v48, %v1244_v18  ;;  %v1229_v62 = vmul.f32 %v1757_v47, %v1197_v36  ;;  %v1194_v21 = vld [vmem:[#allocation3 + $0x20] sm:$0xff]  ;;  %v1066_v36 = vmul.f32 %v2324_v13, %v970_v26  ;;  %v1073_v13 = vmul.f32 %v2344_v9, %v977_v17 }
 0x27c   : > { %940 = vst.msk [vmem:[#allocation3 + $0x50] sm:$0xff] %vm345_vm1, %v923_v49  ;;  %1760 = vrcp.f32 %v1194_v21  ;;  %v974_v26 = vld [vmem:[#allocation4 + $0x60] sm:$0xff] }
 0x27d   : > { %v888_v33 = vpop.xlane.xlu2 %887  ;;  %1318 = vperm.xlu0 %1680, %v1260_v5   ;;  %v1245_v50 = vsub.f32 2.0, %v1229_v62  ;;  %v860_v5 = vld [vmem:[#allocation3 + $0x58] sm:$0xff]  ;;  %v1270_v17 = vld [vmem:[#allocation4] sm:$0xff] }
 0x27e   : > { %v1759_v54 = vpop.eup %1758  ;;  %v916_v14 = vadd.f32 %v888_v33, %v868_v57  ;;  %v900_v31 = vpop.xlane.xlu0 %899  ;;  %v876_v57 = vmul.f32 %v2283_v30, %v860_v5 }
 0x27f   : > { %v922_v35 = vadd.f32 %v900_v31, %v874_v8  ;;  %v1261_v15 = vmul.f32 %v1757_v47, %v1245_v50  ;;  %v1224_v60 = vmul.f32 %v1759_v54, %v1192_v7 }
 0x280   : > { %933 = vst.msk [vmem:[#allocation3 + $0x18] sm:$0xff] %vm345_vm1, %v916_v14  ;;  %v1112_v0 = vpop.f32.mrf.mxu1  ;;  %v1205_v18 = vld [vmem:[#allocation3 + $0x78] sm:$0xff] }
 0x281   : > { %939 = vst.msk [vmem:[#allocation3 + $0x48] sm:$0xff] %vm345_vm1, %v922_v35  ;;  %v1146_v39 = vadd.f32 %v1112_v0, %v1065_v19  ;;  %1323 = vperm.xlu2 %1679, %v1261_v15   ;;  %v1240_v40 = vsub.f32 2.0, %v1224_v60 }
 0x282   : > { %v1761_v4 = vpop.eup %1760 }
 0x283   : > { %1162 = vst.msk [vmem:[#allocation4 + $0x38] sm:$0xff] %vm378_vm0, %v1146_v39  ;;  %v1256_v45 = vmul.f32 %v1759_v54, %v1240_v40  ;;  %v1226_v11 = vmul.f32 %v1761_v4, %v1194_v21  ;;  %v1200_v23 = vld [vmem:[#allocation3 + $0x50] sm:$0xff]  ;;  %v1068_v54 = vmul.f32 %v2341_v43, %v972_v24  ;;  %v1069_v43 = vmul.f32 %v2338_v3, %v973_v27 }
 0x284   : > { %1762 = vrcp.f32 %v1200_v23 }
 0x285   : > { %v898_v58 = vpop.xlane.xlu2 %897  ;;  %v1133_v44 = vpop.f32.mrf.mxu3  ;;  %1298 = vperm.xlu1 %1678, %v1256_v45   ;;  %v1242_v51 = vsub.f32 2.0, %v1226_v11  ;;  %1764 = vrcp.f32 %v1203_v20  ;;  %v1204_v45 = vld [vmem:[#allocation3 + $0x70] sm:$0xff] }
 0x286   : > { %v921_v52 = vadd.f32 %v898_v58, %v873_v28  ;;  %v1153_v61 = vadd.f32 %v1133_v44, %v1072_v38  ;;  %v1070_v28 = vmul.f32 %v2336_v63, %v974_v26  ;;  %v1271_v63 = vld [vmem:[#allocation4 + $0x8] sm:$0xff] }
 0x287   : > { %v1258_v55 = vmul.f32 %v1761_v4, %v1242_v51  ;;  %v1193_v56 = vld [vmem:[#allocation3 + $0x18] sm:$0xff] }
 0x288   : > { %938 = vst.msk [vmem:[#allocation3 + $0x40] sm:$0xff] %vm345_vm1, %v921_v52  ;;  %v1115_v32 = vpop.f32.mrf.mxu1  ;;  %1766 = vrcp.f32 %v1193_v56  ;;  %v1199_v10 = vld [vmem:[#allocation3 + $0x48] sm:$0xff] }
 0x289   : > { %1169 = vst.msk [vmem:[#allocation4 + $0x70] sm:$0xff] %vm378_vm0, %v1153_v61  ;;  %v1147_v6 = vadd.f32 %v1115_v32, %v1066_v36  ;;  %1308 = vperm.xlu2 %1679, %v1258_v55   ;;  %1768 = vrcp.f32 %v1199_v10 }
 0x28a   : > { %v1763_v12 = vpop.eup %1762 }
 0x28b   : > { %1163 = vst.msk [vmem:[#allocation4 + $0x40] sm:$0xff] %vm378_vm0, %v1147_v6  ;;  %v1232_v48 = vmul.f32 %v1763_v12, %v1200_v23  ;;  %v1765_v41 = vpop.eup %1764 }
 0x28c   : > { %v1235_v42 = vmul.f32 %v1765_v41, %v1203_v20 }
 0x28d   : > { %v1136_v46 = vpop.f32.mrf.mxu3  ;;  %v1248_v25 = vsub.f32 2.0, %v1232_v48 }
 0x28e   : > { %v1767_v53 = vpop.eup %1766  ;;  %v1154_v7 = vadd.f32 %v1136_v46, %v1073_v13  ;;  %v1251_v21 = vsub.f32 2.0, %v1235_v42 }
 0x28f   : > { %v1264_v2 = vmul.f32 %v1763_v12, %v1248_v25  ;;  %v1225_v16 = vmul.f32 %v1767_v53, %v1193_v56  ;;  %v1198_v34 = vld [vmem:[#allocation3 + $0x40] sm:$0xff]  ;;  %v1769_v47 = vpop.eup %1768 }
 0x290   : > { %1170 = vst.msk [vmem:[#allocation4 + $0x78] sm:$0xff] %vm378_vm0, %v1154_v7  ;;  %v1118_v49 = vpop.f32.mrf.mxu1  ;;  %1770 = vrcp.f32 %v1198_v34  ;;  %v1231_v22 = vmul.f32 %v1769_v47, %v1199_v10  ;;  %v1267_v14 = vmul.f32 %v1765_v41, %v1251_v21  ;;  %v1277_v41 = vld [vmem:[#allocation4 + $0x38] sm:$0xff] }
 0x291   : > { %v1148_v59 = vadd.f32 %v1118_v49, %v1067_v1  ;;  %1338 = vperm.xlu2 %1679, %v1264_v2   ;;  %v1241_v9 = vsub.f32 2.0, %v1225_v16  ;;  %1772 = vrcp.f32 %v1205_v18  ;;  %v1274_v2 = vld [vmem:[#allocation4 + $0x20] sm:$0xff]  ;;  %v1276_v49 = vld [vmem:[#allocation4 + $0x30] sm:$0xff] }
 0x292   : > { %v1247_v19 = vsub.f32 2.0, %v1231_v22  ;;  %v1272_v22 = vld [vmem:[#allocation4 + $0x10] sm:$0xff] }
 0x293   : > { %1164 = vst.msk [vmem:[#allocation4 + $0x48] sm:$0xff] %vm378_vm0, %v1148_v59  ;;  %v1257_v62 = vmul.f32 %v1767_v53, %v1241_v9  ;;  %v1275_v53 = vld [vmem:[#allocation4 + $0x28] sm:$0xff] }
 0x294   : > { %v1263_v30 = vmul.f32 %v1769_v47, %v1247_v19 }
 0x295   : > { %v904_v33 = vpop.xlane.xlu2 %903  ;;  %1303 = vperm.xlu0 %1680, %v1257_v62   ;;  %v1283_v62 = vld [vmem:[#allocation4 + $0x68] sm:$0xff] }
 0x296   : > { %v1771_v8 = vpop.eup %1770  ;;  %v924_v50 = vadd.f32 %v904_v33, %v876_v57  ;;  %v1273_v33 = vld [vmem:[#allocation4 + $0x18] sm:$0xff] }
 0x297   : > { %v1230_v31 = vmul.f32 %v1771_v8, %v1198_v34  ;;  %v1773_v35 = vpop.eup %1772 }
 0x298   : > { %941 = vst.msk [vmem:[#allocation3 + $0x58] sm:$0xff] %vm345_vm1, %v924_v50  ;;  %v1121_v15 = vpop.f32.mrf.mxu1  ;;  %v1237_v39 = vmul.f32 %v1773_v35, %v1205_v18 }
 0x299   : > { %v1149_v60 = vadd.f32 %v1121_v15, %v1068_v54  ;;  %1353 = vperm.xlu2 %1679, %v1267_v14   ;;  %v1246_v0 = vsub.f32 2.0, %v1230_v31  ;;  %v1278_v54 = vld [vmem:[#allocation4 + $0x40] sm:$0xff] }
 0x29a   : > { %v1253_v40 = vsub.f32 2.0, %v1237_v39  ;;  %v1279_v31 = vld [vmem:[#allocation4 + $0x48] sm:$0xff] }
 0x29b   : > { %1165 = vst.msk [vmem:[#allocation4 + $0x50] sm:$0xff] %vm378_vm0, %v1149_v60  ;;  %v1262_v29 = vmul.f32 %v1771_v8, %v1246_v0  ;;  %v1285_v60 = vld [vmem:[#allocation4 + $0x78] sm:$0xff] }
 0x29c   : > { %v1269_v20 = vmul.f32 %v1773_v35, %v1253_v40 }
 0x29d   : > { %1328 = vperm.xlu1 %1678, %v1262_v29   ;;  %1333 = vperm.xlu0 %1680, %v1263_v30  }
 0x29f   : > { %v1201_v4 = vld [vmem:[#allocation3 + $0x58] sm:$0xff] }
 0x2a0   : > { %v1124_v11 = vpop.f32.mrf.mxu1  ;;  %1774 = vrcp.f32 %v1201_v4 }
 0x2a1   : > { %v1150_v23 = vadd.f32 %v1124_v11, %v1069_v43  ;;  %1776 = vrcp.f32 %v1204_v45  ;;  %v1284_v43 = vld [vmem:[#allocation4 + $0x70] sm:$0xff] }
 0x2a2   : > { %v1280_v18 = vld [vmem:[#allocation4 + $0x50] sm:$0xff] }
 0x2a3   : > { %1166 = vst.msk [vmem:[#allocation4 + $0x58] sm:$0xff] %vm378_vm0, %v1150_v23 }
 0x2a5   : > { %1363 = vperm.xlu0 %1680, %v1269_v20  }
 0x2a6   : > { %v1775_v38 = vpop.eup %1774 }
 0x2a7   : > { %v1233_v58 = vmul.f32 %v1775_v38, %v1201_v4  ;;  %v1777_v44 = vpop.eup %1776 }
 0x2a8   : > { %v1127_v51 = vpop.f32.mrf.mxu1  ;;  %v1236_v36 = vmul.f32 %v1777_v44, %v1204_v45 }
 0x2a9   : > { %v1151_v3 = vadd.f32 %v1127_v51, %v1070_v28  ;;  %v1249_v52 = vsub.f32 2.0, %v1233_v58 }
 0x2aa   : > { %v1252_v55 = vsub.f32 2.0, %v1236_v36  ;;  %v1281_v30 = vld [vmem:[#allocation4 + $0x58] sm:$0xff] }
 0x2ab   : > { %1167 = vst.msk [vmem:[#allocation4 + $0x60] sm:$0xff] %vm378_vm0, %v1151_v3  ;;  %v1265_v61 = vmul.f32 %v1775_v38, %v1249_v52 }
 0x2ac   : > { %v1268_v56 = vmul.f32 %v1777_v44, %v1252_v55 }
 0x2ad   : > { %1343 = vperm.xlu1 %1678, %v1265_v61  }
 0x2b2   : > { %v1282_v13 = vld [vmem:[#allocation4 + $0x60] sm:$0xff] }
 0x2b5   : > { %1358 = vperm.xlu1 %1678, %v1268_v56  }
 0x2cb   : > { %v1294_v32 = vpop.permute.xlu2 %1293 }
 0x2cc   : > { %v1367_v10 = vmul.f32 %v1294_v32, %v1271_v63 }
 0x2ce   : > { %1383 = vst.msk [vmem:[%s2408_s10 + $0x8] sm:$0xff] %vm378_vm0, %v1367_v10 }
 0x2da   : > { %v1289_v6 = vpop.permute.xlu0 %1288 }
 0x2db   : > { %v1366_v12 = vmul.f32 %v1289_v6, %v1270_v17  ;;  %v1324_v48 = vpop.permute.xlu2 %1323 }
 0x2dc   : > { %v1373_v37 = vmul.f32 %v1324_v48, %v1277_v41 }
 0x2dd   : > { %1382 = vst.msk [vmem:[%s2408_s10] sm:$0xff] %vm378_vm0, %v1366_v12 }
 0x2de   : > { %1389 = vst.msk [vmem:[%s2408_s10 + $0x38] sm:$0xff] %vm378_vm0, %v1373_v37 }
 0x2e2   : > { %v1349_v46 = vpop.permute.xlu0 %1348  ;;  %v1314_v25 = vpop.permute.xlu1 %1313 }
 0x2e3   : > { %v1378_v7 = vmul.f32 %v1349_v46, %v1282_v13  ;;  %v1309_v1 = vpop.permute.xlu2 %1308  ;;  %v1371_v16 = vmul.f32 %v1314_v25, %v1275_v53 }
 0x2e4   : > { %v1370_v42 = vmul.f32 %v1309_v1, %v1274_v2 }
 0x2e5   : > { %1394 = vst.msk [vmem:[%s2408_s10 + $0x60] sm:$0xff] %vm378_vm0, %v1378_v7 }
 0x2e6   : > { %1387 = vst.msk [vmem:[%s2408_s10 + $0x28] sm:$0xff] %vm378_vm0, %v1371_v16 }
 0x2e7   : > { %1386 = vst.msk [vmem:[%s2408_s10 + $0x20] sm:$0xff] %vm378_vm0, %v1370_v42 }
 0x2eb   : > { %v1339_v34 = vpop.permute.xlu2 %1338 }
 0x2ec   : > { %v1376_v47 = vmul.f32 %v1339_v34, %v1280_v18 }
 0x2ee   : > { %1392 = vst.msk [vmem:[%s2408_s10 + $0x50] sm:$0xff] %vm378_vm0, %v1376_v47 }
 0x2ef   : > { %v1319_v59 = vpop.permute.xlu0 %1318 }
 0x2f0   : > { %v1372_v5 = vmul.f32 %v1319_v59, %v1276_v49 }
 0x2f2   : > { %1388 = vst.msk [vmem:[%s2408_s10 + $0x30] sm:$0xff] %vm378_vm0, %v1372_v5 }
 0x2f3   : > { %v1354_v9 = vpop.permute.xlu2 %1353 }
 0x2f4   : > { %v1379_v21 = vmul.f32 %v1354_v9, %v1283_v62 }
 0x2f6   : > { %1395 = vst.msk [vmem:[%s2408_s10 + $0x68] sm:$0xff] %vm378_vm0, %v1379_v21 }
 0x2f7   : > { %v1299_v24 = vpop.permute.xlu1 %1298 }
 0x2f8   : > { %v1368_v57 = vmul.f32 %v1299_v24, %v1272_v22 }
 0x2fa   : > { %1384 = vst.msk [vmem:[%s2408_s10 + $0x10] sm:$0xff] %vm378_vm0, %v1368_v57 }
 0x307   : > { %v1304_v8 = vpop.permute.xlu0 %1303 }
 0x308   : > { %v1369_v50 = vmul.f32 %v1304_v8, %v1273_v33 }
 0x30a   : > { %1385 = vst.msk [vmem:[%s2408_s10 + $0x18] sm:$0xff] %vm378_vm0, %v1369_v50 }
 0x30f   : > { %v1329_v14 = vpop.permute.xlu1 %1328  ;;  %v1334_v19 = vpop.permute.xlu0 %1333 }
 0x310   : > { %v1374_v35 = vmul.f32 %v1329_v14, %v1278_v54  ;;  %v1375_v15 = vmul.f32 %v1334_v19, %v1279_v31 }
 0x312   : > { %1390 = vst.msk [vmem:[%s2408_s10 + $0x40] sm:$0xff] %vm378_vm0, %v1374_v35 }
 0x313   : > { %1391 = vst.msk [vmem:[%s2408_s10 + $0x48] sm:$0xff] %vm378_vm0, %v1375_v15 }
 0x317   : > { %v1364_v0 = vpop.permute.xlu0 %1363 }
 0x318   : > { %v1381_v29 = vmul.f32 %v1364_v0, %v1285_v60 }
 0x31a   : > { %1397 = vst.msk [vmem:[%s2408_s10 + $0x78] sm:$0xff] %vm378_vm0, %v1381_v29 }
 0x31f   : > { %v1344_v39 = vpop.permute.xlu1 %1343 }
 0x320   : > { %v1377_v27 = vmul.f32 %v1344_v39, %v1281_v30 }
 0x322   : > { %1393 = vst.msk [vmem:[%s2408_s10 + $0x58] sm:$0xff] %vm378_vm0, %v1377_v27 }
 0x327   : > { %v1359_v40 = vpop.permute.xlu1 %1358 }
 0x328   : > { %v1380_v4 = vmul.f32 %v1359_v40, %v1284_v43 }
 0x32a   : > { %1396 = vst.msk [vmem:[%s2408_s10 + $0x70] sm:$0xff] %vm378_vm0, %v1380_v4 }
 0x32b PF: > { %s14_s17 = sadd.s32 1, %s1800_s17   ;;  %s2456_s15 = smov %s1796_s16 }
 0x32c   : > { %p11_p5 = scmp.ge.s32.totalorder %s14_s17, 4   ;;  %s2457_s16 = smov %s2459_s18 }
 0x32e   :  { %13 = sbr.rel (!%p11_p5) target bundleno = 2 (0x2), region = 83 }

</bundles_post_ra>
